<compile_context>
chip_gen: v5e
topology: v5e:2x2
jax: 0.10.0
libtpu: 0.0.40
codegen_flags: <defaults>
</compile_context>

<pallas_src>
import functools

import jax
import jax.numpy as jnp
import numpy as np
from jax import lax
from jax.experimental import pallas as pl
from jax.experimental.pallas import tpu as pltpu


def actor_kernel(seq_ref,      # (T*BP, D_in)  time-major flattened history, f32, VMEM
                 state_ref,    # (BP, S)                                      f32, VMEM
                 gru_wi_ref,   # (D_in, 3G)  [W_ir|0 | W_iz|0 | W_in|0]        f32, VMEM
                 gru_wh_ref,   # (G, 3G)     rows >=H are zero                 f32, VMEM
                 gru_b_ref,    # (2, 3G)  row0=[bir+bhr|biz+bhz|bin], row1=[0|0|bhn]
                 mlp_b_ref,    # (3, hid)  rows b1, b2, b3(zero-padded)        f32, VMEM
                 w1s_hbm,      # (S, hid)   bf16, HBM (pl.ANY)
                 w1c_hbm,      # (G, hid)   bf16, HBM  (rows >=H zero)
                 w2_hbm,       # (hid, hid) bf16, HBM
                 w3_hbm,       # (hid, OUT_PAD) bf16, HBM (cols >=A zero)
                 out_ref,      # (BP, OUT_PAD) f32, VMEM
                 w1s_v, w1c_v, w2_v, w3_v,      # VMEM scratch for MLP weights
                 dma_sems,                      # SemaphoreType.DMA((4,))
                 *, BP, T, G, max_action):
    def dot(a, b):
        return jnp.dot(a, b, preferred_element_type=jnp.float32)

    # ---- Kick off MLP-weight HBM->VMEM DMAs; they overlap the GRU chain. ----
    cp_w1s = pltpu.make_async_copy(w1s_hbm, w1s_v, dma_sems.at[0])
    cp_w1c = pltpu.make_async_copy(w1c_hbm, w1c_v, dma_sems.at[1])
    cp_w2 = pltpu.make_async_copy(w2_hbm, w2_v, dma_sems.at[2])
    cp_w3 = pltpu.make_async_copy(w3_hbm, w3_v, dma_sems.at[3])
    cp_w1s.start(); cp_w1c.start(); cp_w2.start(); cp_w3.start()

    G2, G3 = 2 * G, 3 * G

    # ---- GRU: hoisted, gate-fused input projection (one MXU matmul covers all
    # T steps; the serial loop only carries the h-dependent matmul). ----------
    b_x = gru_b_ref[0:1, :]                         # (1, 3G)
    b_hn = gru_b_ref[1:2, G2:G3]                    # (1, G)  lane-aligned slice
    x_proj = dot(seq_ref[...], gru_wi_ref[...]) + b_x   # (T*BP, 3G), time-major
    w_h = gru_wh_ref[...]                           # (G, 3G)

    # t = 0 peeled: h0 == 0 so the hidden-state projection is zero.
    x0 = x_proj[0:BP, :]
    r = jax.nn.sigmoid(x0[:, 0:G])
    z = jax.nn.sigmoid(x0[:, G:G2])
    n = jnp.tanh(x0[:, G2:G3] + r * b_hn)
    h = (1.0 - z) * n                               # (BP, G); cols >=H stay 0

    # Remaining steps: one fused (BP,G)x(G,3G) matmul each; fully unrolled with
    # static, sublane-aligned (multiple of BP=8) row slices and lane-aligned
    # gate slices.
    for t in range(1, T):
        hp = dot(h, w_h)                            # (BP, 3G)
        xt = x_proj[t * BP:(t + 1) * BP, :]         # (BP, 3G)
        r = jax.nn.sigmoid(xt[:, 0:G] + hp[:, 0:G])
        z = jax.nn.sigmoid(xt[:, G:G2] + hp[:, G:G2])
        n = jnp.tanh(xt[:, G2:G3] + r * (hp[:, G2:G3] + b_hn))
        h = (1.0 - z) * n + z * h

    # ---- MLP head.  cat([state, h]) @ W1 == state @ W1s + h @ W1c (padded h
    # columns hit zero rows of W1c).  bf16 operands, f32 accumulation. --------
    cp_w1s.wait(); cp_w1c.wait()
    mm_dt = w1s_v.dtype
    a1 = jnp.maximum(dot(state_ref[...].astype(mm_dt), w1s_v[...])
                     + dot(h.astype(mm_dt), w1c_v[...])
                     + mlp_b_ref[0:1, :], 0.0)
    cp_w2.wait()
    a2 = jnp.maximum(dot(a1.astype(mm_dt), w2_v[...]) + mlp_b_ref[1:2, :], 0.0)
    cp_w3.wait()
    n_out = out_ref.shape[1]                        # lane-dense padded width
    out_ref[...] = max_action * jnp.tanh(dot(a2.astype(mm_dt), w3_v[...])
                                         + mlp_b_ref[2:3, 0:n_out])


def pack_params(p, *, action_dim, gate_pad=128, out_pad=128,
                mlp_dtype=jnp.bfloat16):
    """One-time fusion/padding of the 19 raw parameter arrays into 10 operands."""
    H = p["w_hr"].shape[0]
    d_in = p["w_ir"].shape[0]
    hid = p["w2"].shape[0]
    G = gate_pad
    assert H <= G, "hidden size exceeds gate padding"
    assert action_dim <= out_pad <= hid, "action_dim padding exceeds MLP width"

    def gates(blocks, rows):
        """Place 3 gate blocks at lane offsets 0, G, 2G; zero elsewhere."""
        out = jnp.zeros((rows, 3 * G), jnp.float32)
        for k, blk in enumerate(blocks):
            out = out.at[:blk.shape[0], k * G:k * G + blk.shape[1]].set(blk)
        return out

    gru_wi = gates([p["w_ir"], p["w_iz"], p["w_in"]], d_in)          # (D_in, 3G)
    gru_wh = gates([p["w_hr"], p["w_hz"], p["w_hn"]], G)             # (G, 3G)
    b_row0 = gates([p["b_ir"] + p["b_hr"], p["b_iz"] + p["b_hz"], p["b_in"]], 1)
    b_row1 = gates([jnp.zeros_like(p["b_hn"]), jnp.zeros_like(p["b_hn"]),
                    p["b_hn"]], 1)
    gru_b = jnp.concatenate([b_row0, b_row1], axis=0)                # (2, 3G)

    w1s = p["w1s"].astype(mlp_dtype)                                 # (S, hid)
    w1c = (jnp.zeros((G, hid), jnp.float32).at[:H].set(p["w1c"])
           .astype(mlp_dtype))                                       # (G, hid)
    w2 = p["w2"].astype(mlp_dtype)                                   # (hid, hid)
    w3 = (jnp.zeros((hid, out_pad), jnp.float32)
          .at[:, :action_dim].set(p["w3"]).astype(mlp_dtype))        # (hid, out_pad)
    b3 = jnp.zeros((1, hid), jnp.float32).at[:, :action_dim].set(p["b3"])
    mlp_b = jnp.concatenate([p["b1"], p["b2"], b3], axis=0)          # (3, hid)

    return dict(gru_wi=gru_wi, gru_wh=gru_wh, gru_b=gru_b,
                w1s=w1s, w1c=w1c, w2=w2, w3=w3, mlp_b=mlp_b)


def actor_forward(packed, state, pre_infos, *, state_dim, action_dim, max_action):
    """JAX wrapper: cheap reshapes/padding in XLA, hot path in one Pallas kernel."""
    prev_action, prev_reward, pre_x = pre_infos
    B = prev_action.shape[0]
    A, S = action_dim, state_dim

    pacts = prev_action.reshape(B, -1, A)
    prews = prev_reward.reshape(B, -1, 1)
    pxs = pre_x.reshape(B, -1, S)
    seq = jnp.concatenate([pacts, prews, pxs], axis=-1).astype(jnp.float32)  # (B,T,D)
    T, d_in = seq.shape[1], seq.shape[2]

    # Pad the batch to a full 8-row sublane tile; time-major flat layout so
    # step t is the contiguous, 8-aligned row block [t*BP, (t+1)*BP).
    BP = max(8, ((B + 7) // 8) * 8)
    seq_tm = jnp.transpose(seq, (1, 0, 2))                                   # (T,B,D)
    seq_tm = jnp.pad(seq_tm, ((0, 0), (0, BP - B), (0, 0))).reshape(T * BP, d_in)
    state_p = jnp.pad(state.astype(jnp.float32), ((0, BP - B), (0, 0)))      # (BP,S)

    G = packed["gru_wh"].shape[0]
    hid = packed["w2"].shape[0]
    out_pad = packed["w3"].shape[1]
    mlp_dtype = packed["w2"].dtype

    vmem = pl.BlockSpec(memory_space=pltpu.MemorySpace.VMEM)
    anyspace = pl.BlockSpec(memory_space=pl.ANY)

    out_padded = pl.pallas_call(
        functools.partial(actor_kernel, BP=BP, T=T, G=G,
                          max_action=float(max_action)),
        out_shape=jax.ShapeDtypeStruct((BP, out_pad), jnp.float32),
        in_specs=[vmem] * 6 + [anyspace] * 4,
        out_specs=vmem,
        scratch_shapes=[
            pltpu.VMEM(packed["w1s"].shape, mlp_dtype),
            pltpu.VMEM((G, hid), mlp_dtype),
            pltpu.VMEM((hid, hid), mlp_dtype),
            pltpu.VMEM((hid, out_pad), mlp_dtype),
            pltpu.SemaphoreType.DMA((4,)),
        ],
    )(seq_tm, state_p,
      packed["gru_wi"], packed["gru_wh"], packed["gru_b"], packed["mlp_b"],
      packed["w1s"], packed["w1c"], packed["w2"], packed["w3"])
    return out_padded[:B, :A]


def init_params(key, state_dim, action_dim, ctx_hidden=30, mlp_hidden=256):
    """Deterministic synthetic params (PyTorch-style uniform(-1/sqrt(fan), ...))."""
    d_in = state_dim + action_dim + 1
    ks = iter(jax.random.split(key, 32))

    def u(shape, fan_in):
        bound = 1.0 / np.sqrt(fan_in)
        return jax.random.uniform(next(ks), shape, jnp.float32, -bound, bound)

    H = ctx_hidden
    p = {}
    # GRU gates (weights stored pre-transposed: (in, out)); torch uses 1/sqrt(H).
    for g in ("r", "z", "n"):
        p[f"w_i{g}"] = u((d_in, H), H)
        p[f"w_h{g}"] = u((H, H), H)
        p[f"b_i{g}"] = u((1, H), H)
        p[f"b_h{g}"] = u((1, H), H)
    # l1 split into state / context blocks, fan_in = state_dim + 30.
    fan1 = state_dim + H
    p["w1s"] = u((state_dim, mlp_hidden), fan1)
    p["w1c"] = u((H, mlp_hidden), fan1)
    p["b1"] = u((1, mlp_hidden), fan1)
    p["w2"] = u((mlp_hidden, mlp_hidden), mlp_hidden)
    p["b2"] = u((1, mlp_hidden), mlp_hidden)
    p["w3"] = u((mlp_hidden, action_dim), mlp_hidden)
    p["b3"] = u((1, action_dim), mlp_hidden)
    return p


def actor_forward_ref(params, state, pre_infos, *, state_dim, action_dim, max_action):
    """Pure-JAX f32 reference (unfused params) for correctness checking."""
    prev_action, prev_reward, pre_x = pre_infos
    B = prev_action.shape[0]
    pacts = prev_action.reshape(B, -1, action_dim)
    prews = prev_reward.reshape(B, -1, 1)
    pxs = pre_x.reshape(B, -1, state_dim)
    seq = jnp.concatenate([pacts, prews, pxs], axis=-1)          # (B, T, D_in)

    def step(h, x_t):
        r = jax.nn.sigmoid(x_t @ params["w_ir"] + params["b_ir"]
                           + h @ params["w_hr"] + params["b_hr"])
        z = jax.nn.sigmoid(x_t @ params["w_iz"] + params["b_iz"]
                           + h @ params["w_hz"] + params["b_hz"])
        n = jnp.tanh(x_t @ params["w_in"] + params["b_in"]
                     + r * (h @ params["w_hn"] + params["b_hn"]))
        return (1.0 - z) * n + z * h, None

    h0 = jnp.zeros((B, params["w_hr"].shape[0]), jnp.float32)
    h_final, _ = lax.scan(step, h0, jnp.transpose(seq, (1, 0, 2)))

    a1 = jax.nn.relu(state @ params["w1s"] + h_final @ params["w1c"] + params["b1"])
    a2 = jax.nn.relu(a1 @ params["w2"] + params["b2"])
    return max_action * jnp.tanh(a2 @ params["w3"] + params["b3"])


if __name__ == "__main__":
    B = 2
    state_dim = 16
    action_dim = 4
    hist_len = 8
    max_action = 2.0

    key = jax.random.PRNGKey(0)
    k_p, k_s, k_a, k_r, k_x = jax.random.split(key, 5)

    params = init_params(k_p, state_dim, action_dim)
    packed = pack_params(params, action_dim=action_dim)

    state = jax.random.normal(k_s, (B, state_dim), jnp.float32)
    prev_action = jax.random.normal(k_a, (B, hist_len * action_dim), jnp.float32)
    prev_reward = jax.random.normal(k_r, (B, hist_len), jnp.float32)
    pre_x = jax.random.normal(k_x, (B, hist_len * state_dim), jnp.float32)
    pre_infos = (prev_action, prev_reward, pre_x)

    out = actor_forward(packed, state, pre_infos,
                        state_dim=state_dim, action_dim=action_dim,
                        max_action=max_action)
    out = jax.block_until_ready(out)

    ref = actor_forward_ref(params, state, pre_infos,
                            state_dim=state_dim, action_dim=action_dim,
                            max_action=max_action)
    ref = jax.block_until_ready(ref)

    assert out.shape == (B, action_dim)
    # MLP matmuls use bf16 weights/operands (f32 accumulation); GRU stays f32.
    np.testing.assert_allclose(np.asarray(out), np.asarray(ref), rtol=2e-2, atol=2e-2)

    print("KERNEL_OK")
</pallas_src>

<mosaic_0001>
module attributes {stable_mosaic.version = 11 : i64} {
  func.func @actor_kernel(%arg0: memref<64x21xf32, #tpu.memory_space<vmem>>, %arg1: memref<8x16xf32, #tpu.memory_space<vmem>>, %arg2: memref<21x384xf32, #tpu.memory_space<vmem>>, %arg3: memref<128x384xf32, #tpu.memory_space<vmem>>, %arg4: memref<2x384xf32, #tpu.memory_space<vmem>>, %arg5: memref<3x256xf32, #tpu.memory_space<vmem>>, %arg6: memref<16x256xbf16, #tpu.memory_space<any>>, %arg7: memref<128x256xbf16, #tpu.memory_space<any>>, %arg8: memref<256x256xbf16, #tpu.memory_space<any>>, %arg9: memref<256x128xbf16, #tpu.memory_space<any>>, %arg10: memref<8x128xf32, #tpu.memory_space<vmem>>, %arg11: memref<16x256xbf16, #tpu.memory_space<vmem>>, %arg12: memref<128x256xbf16, #tpu.memory_space<vmem>>, %arg13: memref<256x256xbf16, #tpu.memory_space<vmem>>, %arg14: memref<256x128xbf16, #tpu.memory_space<vmem>>, %arg15: memref<4x!tpu.dma_semaphore, #tpu.memory_space<semaphore_mem>>) attributes {dimension_semantics = [], scalar_prefetch = 0 : i64, scratch_operands = 5 : i64, tpu.core_type = #tpu.core_type<tc>} {
    %c0_i32 = arith.constant 0 : i32
    %0 = tpu.memref_slice %arg15[%c0_i32] : memref<4x!tpu.dma_semaphore, #tpu.memory_space<semaphore_mem>> -> memref<1x!tpu.dma_semaphore, #tpu.memory_space<semaphore_mem>>
    %1 = tpu.memref_squeeze %0 : memref<1x!tpu.dma_semaphore, #tpu.memory_space<semaphore_mem>> -> memref<!tpu.dma_semaphore, #tpu.memory_space<semaphore_mem>>
    tpu.enqueue_dma source(%arg6 : memref<16x256xbf16, #tpu.memory_space<any>>) target(%arg11 : memref<16x256xbf16, #tpu.memory_space<vmem>>) target_semaphore(%1 : memref<!tpu.dma_semaphore, #tpu.memory_space<semaphore_mem>>)
    %c1_i32 = arith.constant 1 : i32
    %2 = tpu.memref_slice %arg15[%c1_i32] : memref<4x!tpu.dma_semaphore, #tpu.memory_space<semaphore_mem>> -> memref<1x!tpu.dma_semaphore, #tpu.memory_space<semaphore_mem>>
    %3 = tpu.memref_squeeze %2 : memref<1x!tpu.dma_semaphore, #tpu.memory_space<semaphore_mem>> -> memref<!tpu.dma_semaphore, #tpu.memory_space<semaphore_mem>>
    tpu.enqueue_dma source(%arg7 : memref<128x256xbf16, #tpu.memory_space<any>>) target(%arg12 : memref<128x256xbf16, #tpu.memory_space<vmem>>) target_semaphore(%3 : memref<!tpu.dma_semaphore, #tpu.memory_space<semaphore_mem>>)
    %c2_i32 = arith.constant 2 : i32
    %4 = tpu.memref_slice %arg15[%c2_i32] : memref<4x!tpu.dma_semaphore, #tpu.memory_space<semaphore_mem>> -> memref<1x!tpu.dma_semaphore, #tpu.memory_space<semaphore_mem>>
    %5 = tpu.memref_squeeze %4 : memref<1x!tpu.dma_semaphore, #tpu.memory_space<semaphore_mem>> -> memref<!tpu.dma_semaphore, #tpu.memory_space<semaphore_mem>>
    tpu.enqueue_dma source(%arg8 : memref<256x256xbf16, #tpu.memory_space<any>>) target(%arg13 : memref<256x256xbf16, #tpu.memory_space<vmem>>) target_semaphore(%5 : memref<!tpu.dma_semaphore, #tpu.memory_space<semaphore_mem>>)
    %c3_i32 = arith.constant 3 : i32
    %6 = tpu.memref_slice %arg15[%c3_i32] : memref<4x!tpu.dma_semaphore, #tpu.memory_space<semaphore_mem>> -> memref<1x!tpu.dma_semaphore, #tpu.memory_space<semaphore_mem>>
    %7 = tpu.memref_squeeze %6 : memref<1x!tpu.dma_semaphore, #tpu.memory_space<semaphore_mem>> -> memref<!tpu.dma_semaphore, #tpu.memory_space<semaphore_mem>>
    tpu.enqueue_dma source(%arg9 : memref<256x128xbf16, #tpu.memory_space<any>>) target(%arg14 : memref<256x128xbf16, #tpu.memory_space<vmem>>) target_semaphore(%7 : memref<!tpu.dma_semaphore, #tpu.memory_space<semaphore_mem>>)
    %c0 = arith.constant 0 : index
    %c0_0 = arith.constant 0 : index
    %8 = vector.load %arg4[%c0, %c0_0] : memref<2x384xf32, #tpu.memory_space<vmem>>, vector<1x384xf32>
    %c1 = arith.constant 1 : index
    %c256 = arith.constant 256 : index
    %9 = vector.load %arg4[%c1, %c256] : memref<2x384xf32, #tpu.memory_space<vmem>>, vector<1x128xf32>
    %c0_1 = arith.constant 0 : index
    %c0_2 = arith.constant 0 : index
    %10 = vector.load %arg0[%c0_1, %c0_2] : memref<64x21xf32, #tpu.memory_space<vmem>>, vector<64x21xf32>
    %c0_3 = arith.constant 0 : index
    %c0_4 = arith.constant 0 : index
    %11 = vector.load %arg2[%c0_3, %c0_4] : memref<21x384xf32, #tpu.memory_space<vmem>>, vector<21x384xf32>
    %cst = arith.constant dense<0.000000e+00> : vector<64x384xf32>
    %12 = tpu.matmul %10, %11, %cst {dimension_numbers = #tpu.dot_dimension_numbers<[1], [0], [0], [1], [0, 0, 1, 1], [], []>} : vector<64x21xf32>, vector<21x384xf32>, vector<64x384xf32> -> vector<64x384xf32>
    %13 = vector.broadcast %8 : vector<1x384xf32> to vector<64x384xf32>
    %14 = arith.addf %12, %13 : vector<64x384xf32>
    %c0_5 = arith.constant 0 : index
    %c0_6 = arith.constant 0 : index
    %15 = vector.load %arg3[%c0_5, %c0_6] : memref<128x384xf32, #tpu.memory_space<vmem>>, vector<128x384xf32>
    %16 = vector.extract_strided_slice %14 {offsets = [0, 0], sizes = [8, 384], strides = [1, 1]} : vector<64x384xf32> to vector<8x384xf32>
    %17 = vector.extract_strided_slice %16 {offsets = [0, 0], sizes = [8, 128], strides = [1, 1]} : vector<8x384xf32> to vector<8x128xf32>
    %18 = arith.negf %17 : vector<8x128xf32>
    %19 = math.exp %18 : vector<8x128xf32>
    %cst_7 = arith.constant 1.000000e+00 : f32
    %20 = vector.broadcast %cst_7 : f32 to vector<8x128xf32>
    %21 = arith.addf %20, %19 : vector<8x128xf32>
    %22 = arith.divf %20, %21 : vector<8x128xf32>
    %23 = vector.extract_strided_slice %16 {offsets = [0, 128], sizes = [8, 128], strides = [1, 1]} : vector<8x384xf32> to vector<8x128xf32>
    %24 = arith.negf %23 : vector<8x128xf32>
    %25 = math.exp %24 : vector<8x128xf32>
    %cst_8 = arith.constant 1.000000e+00 : f32
    %26 = vector.broadcast %cst_8 : f32 to vector<8x128xf32>
    %27 = arith.addf %26, %25 : vector<8x128xf32>
    %28 = arith.divf %26, %27 : vector<8x128xf32>
    %29 = vector.extract_strided_slice %16 {offsets = [0, 256], sizes = [8, 128], strides = [1, 1]} : vector<8x384xf32> to vector<8x128xf32>
    %30 = vector.broadcast %9 : vector<1x128xf32> to vector<8x128xf32>
    %31 = arith.mulf %22, %30 : vector<8x128xf32>
    %32 = arith.addf %29, %31 : vector<8x128xf32>
    %33 = math.tanh %32 : vector<8x128xf32>
    %cst_9 = arith.constant 1.000000e+00 : f32
    %34 = vector.broadcast %cst_9 : f32 to vector<8x128xf32>
    %35 = arith.subf %34, %28 : vector<8x128xf32>
    %36 = arith.mulf %35, %33 : vector<8x128xf32>
    %cst_10 = arith.constant dense<0.000000e+00> : vector<8x384xf32>
    %37 = tpu.matmul %36, %15, %cst_10 {dimension_numbers = #tpu.dot_dimension_numbers<[1], [0], [0], [1], [0, 0, 1, 1], [], []>} : vector<8x128xf32>, vector<128x384xf32>, vector<8x384xf32> -> vector<8x384xf32>
    %38 = vector.extract_strided_slice %14 {offsets = [8, 0], sizes = [8, 384], strides = [1, 1]} : vector<64x384xf32> to vector<8x384xf32>
    %39 = vector.extract_strided_slice %38 {offsets = [0, 0], sizes = [8, 128], strides = [1, 1]} : vector<8x384xf32> to vector<8x128xf32>
    %40 = vector.extract_strided_slice %37 {offsets = [0, 0], sizes = [8, 128], strides = [1, 1]} : vector<8x384xf32> to vector<8x128xf32>
    %41 = arith.addf %39, %40 : vector<8x128xf32>
    %42 = arith.negf %41 : vector<8x128xf32>
    %43 = math.exp %42 : vector<8x128xf32>
    %cst_11 = arith.constant 1.000000e+00 : f32
    %44 = vector.broadcast %cst_11 : f32 to vector<8x128xf32>
    %45 = arith.addf %44, %43 : vector<8x128xf32>
    %46 = arith.divf %44, %45 : vector<8x128xf32>
    %47 = vector.extract_strided_slice %38 {offsets = [0, 128], sizes = [8, 128], strides = [1, 1]} : vector<8x384xf32> to vector<8x128xf32>
    %48 = vector.extract_strided_slice %37 {offsets = [0, 128], sizes = [8, 128], strides = [1, 1]} : vector<8x384xf32> to vector<8x128xf32>
    %49 = arith.addf %47, %48 : vector<8x128xf32>
    %50 = arith.negf %49 : vector<8x128xf32>
    %51 = math.exp %50 : vector<8x128xf32>
    %cst_12 = arith.constant 1.000000e+00 : f32
    %52 = vector.broadcast %cst_12 : f32 to vector<8x128xf32>
    %53 = arith.addf %52, %51 : vector<8x128xf32>
    %54 = arith.divf %52, %53 : vector<8x128xf32>
    %55 = vector.extract_strided_slice %38 {offsets = [0, 256], sizes = [8, 128], strides = [1, 1]} : vector<8x384xf32> to vector<8x128xf32>
    %56 = vector.extract_strided_slice %37 {offsets = [0, 256], sizes = [8, 128], strides = [1, 1]} : vector<8x384xf32> to vector<8x128xf32>
    %57 = vector.broadcast %9 : vector<1x128xf32> to vector<8x128xf32>
    %58 = arith.addf %56, %57 : vector<8x128xf32>
    %59 = arith.mulf %46, %58 : vector<8x128xf32>
    %60 = arith.addf %55, %59 : vector<8x128xf32>
    %61 = math.tanh %60 : vector<8x128xf32>
    %cst_13 = arith.constant 1.000000e+00 : f32
    %62 = vector.broadcast %cst_13 : f32 to vector<8x128xf32>
    %63 = arith.subf %62, %54 : vector<8x128xf32>
    %64 = arith.mulf %63, %61 : vector<8x128xf32>
    %65 = arith.mulf %54, %36 : vector<8x128xf32>
    %66 = arith.addf %64, %65 : vector<8x128xf32>
    %cst_14 = arith.constant dense<0.000000e+00> : vector<8x384xf32>
    %67 = tpu.matmul %66, %15, %cst_14 {dimension_numbers = #tpu.dot_dimension_numbers<[1], [0], [0], [1], [0, 0, 1, 1], [], []>} : vector<8x128xf32>, vector<128x384xf32>, vector<8x384xf32> -> vector<8x384xf32>
    %68 = vector.extract_strided_slice %14 {offsets = [16, 0], sizes = [8, 384], strides = [1, 1]} : vector<64x384xf32> to vector<8x384xf32>
    %69 = vector.extract_strided_slice %68 {offsets = [0, 0], sizes = [8, 128], strides = [1, 1]} : vector<8x384xf32> to vector<8x128xf32>
    %70 = vector.extract_strided_slice %67 {offsets = [0, 0], sizes = [8, 128], strides = [1, 1]} : vector<8x384xf32> to vector<8x128xf32>
    %71 = arith.addf %69, %70 : vector<8x128xf32>
    %72 = arith.negf %71 : vector<8x128xf32>
    %73 = math.exp %72 : vector<8x128xf32>
    %cst_15 = arith.constant 1.000000e+00 : f32
    %74 = vector.broadcast %cst_15 : f32 to vector<8x128xf32>
    %75 = arith.addf %74, %73 : vector<8x128xf32>
    %76 = arith.divf %74, %75 : vector<8x128xf32>
    %77 = vector.extract_strided_slice %68 {offsets = [0, 128], sizes = [8, 128], strides = [1, 1]} : vector<8x384xf32> to vector<8x128xf32>
    %78 = vector.extract_strided_slice %67 {offsets = [0, 128], sizes = [8, 128], strides = [1, 1]} : vector<8x384xf32> to vector<8x128xf32>
    %79 = arith.addf %77, %78 : vector<8x128xf32>
    %80 = arith.negf %79 : vector<8x128xf32>
    %81 = math.exp %80 : vector<8x128xf32>
    %cst_16 = arith.constant 1.000000e+00 : f32
    %82 = vector.broadcast %cst_16 : f32 to vector<8x128xf32>
    %83 = arith.addf %82, %81 : vector<8x128xf32>
    %84 = arith.divf %82, %83 : vector<8x128xf32>
    %85 = vector.extract_strided_slice %68 {offsets = [0, 256], sizes = [8, 128], strides = [1, 1]} : vector<8x384xf32> to vector<8x128xf32>
    %86 = vector.extract_strided_slice %67 {offsets = [0, 256], sizes = [8, 128], strides = [1, 1]} : vector<8x384xf32> to vector<8x128xf32>
    %87 = vector.broadcast %9 : vector<1x128xf32> to vector<8x128xf32>
    %88 = arith.addf %86, %87 : vector<8x128xf32>
    %89 = arith.mulf %76, %88 : vector<8x128xf32>
    %90 = arith.addf %85, %89 : vector<8x128xf32>
    %91 = math.tanh %90 : vector<8x128xf32>
    %cst_17 = arith.constant 1.000000e+00 : f32
    %92 = vector.broadcast %cst_17 : f32 to vector<8x128xf32>
    %93 = arith.subf %92, %84 : vector<8x128xf32>
    %94 = arith.mulf %93, %91 : vector<8x128xf32>
    %95 = arith.mulf %84, %66 : vector<8x128xf32>
    %96 = arith.addf %94, %95 : vector<8x128xf32>
    %cst_18 = arith.constant dense<0.000000e+00> : vector<8x384xf32>
    %97 = tpu.matmul %96, %15, %cst_18 {dimension_numbers = #tpu.dot_dimension_numbers<[1], [0], [0], [1], [0, 0, 1, 1], [], []>} : vector<8x128xf32>, vector<128x384xf32>, vector<8x384xf32> -> vector<8x384xf32>
    %98 = vector.extract_strided_slice %14 {offsets = [24, 0], sizes = [8, 384], strides = [1, 1]} : vector<64x384xf32> to vector<8x384xf32>
    %99 = vector.extract_strided_slice %98 {offsets = [0, 0], sizes = [8, 128], strides = [1, 1]} : vector<8x384xf32> to vector<8x128xf32>
    %100 = vector.extract_strided_slice %97 {offsets = [0, 0], sizes = [8, 128], strides = [1, 1]} : vector<8x384xf32> to vector<8x128xf32>
    %101 = arith.addf %99, %100 : vector<8x128xf32>
    %102 = arith.negf %101 : vector<8x128xf32>
    %103 = math.exp %102 : vector<8x128xf32>
    %cst_19 = arith.constant 1.000000e+00 : f32
    %104 = vector.broadcast %cst_19 : f32 to vector<8x128xf32>
    %105 = arith.addf %104, %103 : vector<8x128xf32>
    %106 = arith.divf %104, %105 : vector<8x128xf32>
    %107 = vector.extract_strided_slice %98 {offsets = [0, 128], sizes = [8, 128], strides = [1, 1]} : vector<8x384xf32> to vector<8x128xf32>
    %108 = vector.extract_strided_slice %97 {offsets = [0, 128], sizes = [8, 128], strides = [1, 1]} : vector<8x384xf32> to vector<8x128xf32>
    %109 = arith.addf %107, %108 : vector<8x128xf32>
    %110 = arith.negf %109 : vector<8x128xf32>
    %111 = math.exp %110 : vector<8x128xf32>
    %cst_20 = arith.constant 1.000000e+00 : f32
    %112 = vector.broadcast %cst_20 : f32 to vector<8x128xf32>
    %113 = arith.addf %112, %111 : vector<8x128xf32>
    %114 = arith.divf %112, %113 : vector<8x128xf32>
    %115 = vector.extract_strided_slice %98 {offsets = [0, 256], sizes = [8, 128], strides = [1, 1]} : vector<8x384xf32> to vector<8x128xf32>
    %116 = vector.extract_strided_slice %97 {offsets = [0, 256], sizes = [8, 128], strides = [1, 1]} : vector<8x384xf32> to vector<8x128xf32>
    %117 = vector.broadcast %9 : vector<1x128xf32> to vector<8x128xf32>
    %118 = arith.addf %116, %117 : vector<8x128xf32>
    %119 = arith.mulf %106, %118 : vector<8x128xf32>
    %120 = arith.addf %115, %119 : vector<8x128xf32>
    %121 = math.tanh %120 : vector<8x128xf32>
    %cst_21 = arith.constant 1.000000e+00 : f32
    %122 = vector.broadcast %cst_21 : f32 to vector<8x128xf32>
    %123 = arith.subf %122, %114 : vector<8x128xf32>
    %124 = arith.mulf %123, %121 : vector<8x128xf32>
    %125 = arith.mulf %114, %96 : vector<8x128xf32>
    %126 = arith.addf %124, %125 : vector<8x128xf32>
    %cst_22 = arith.constant dense<0.000000e+00> : vector<8x384xf32>
    %127 = tpu.matmul %126, %15, %cst_22 {dimension_numbers = #tpu.dot_dimension_numbers<[1], [0], [0], [1], [0, 0, 1, 1], [], []>} : vector<8x128xf32>, vector<128x384xf32>, vector<8x384xf32> -> vector<8x384xf32>
    %128 = vector.extract_strided_slice %14 {offsets = [32, 0], sizes = [8, 384], strides = [1, 1]} : vector<64x384xf32> to vector<8x384xf32>
    %129 = vector.extract_strided_slice %128 {offsets = [0, 0], sizes = [8, 128], strides = [1, 1]} : vector<8x384xf32> to vector<8x128xf32>
    %130 = vector.extract_strided_slice %127 {offsets = [0, 0], sizes = [8, 128], strides = [1, 1]} : vector<8x384xf32> to vector<8x128xf32>
    %131 = arith.addf %129, %130 : vector<8x128xf32>
    %132 = arith.negf %131 : vector<8x128xf32>
    %133 = math.exp %132 : vector<8x128xf32>
    %cst_23 = arith.constant 1.000000e+00 : f32
    %134 = vector.broadcast %cst_23 : f32 to vector<8x128xf32>
    %135 = arith.addf %134, %133 : vector<8x128xf32>
    %136 = arith.divf %134, %135 : vector<8x128xf32>
    %137 = vector.extract_strided_slice %128 {offsets = [0, 128], sizes = [8, 128], strides = [1, 1]} : vector<8x384xf32> to vector<8x128xf32>
    %138 = vector.extract_strided_slice %127 {offsets = [0, 128], sizes = [8, 128], strides = [1, 1]} : vector<8x384xf32> to vector<8x128xf32>
    %139 = arith.addf %137, %138 : vector<8x128xf32>
    %140 = arith.negf %139 : vector<8x128xf32>
    %141 = math.exp %140 : vector<8x128xf32>
    %cst_24 = arith.constant 1.000000e+00 : f32
    %142 = vector.broadcast %cst_24 : f32 to vector<8x128xf32>
    %143 = arith.addf %142, %141 : vector<8x128xf32>
    %144 = arith.divf %142, %143 : vector<8x128xf32>
    %145 = vector.extract_strided_slice %128 {offsets = [0, 256], sizes = [8, 128], strides = [1, 1]} : vector<8x384xf32> to vector<8x128xf32>
    %146 = vector.extract_strided_slice %127 {offsets = [0, 256], sizes = [8, 128], strides = [1, 1]} : vector<8x384xf32> to vector<8x128xf32>
    %147 = vector.broadcast %9 : vector<1x128xf32> to vector<8x128xf32>
    %148 = arith.addf %146, %147 : vector<8x128xf32>
    %149 = arith.mulf %136, %148 : vector<8x128xf32>
    %150 = arith.addf %145, %149 : vector<8x128xf32>
    %151 = math.tanh %150 : vector<8x128xf32>
    %cst_25 = arith.constant 1.000000e+00 : f32
    %152 = vector.broadcast %cst_25 : f32 to vector<8x128xf32>
    %153 = arith.subf %152, %144 : vector<8x128xf32>
    %154 = arith.mulf %153, %151 : vector<8x128xf32>
    %155 = arith.mulf %144, %126 : vector<8x128xf32>
    %156 = arith.addf %154, %155 : vector<8x128xf32>
    %cst_26 = arith.constant dense<0.000000e+00> : vector<8x384xf32>
    %157 = tpu.matmul %156, %15, %cst_26 {dimension_numbers = #tpu.dot_dimension_numbers<[1], [0], [0], [1], [0, 0, 1, 1], [], []>} : vector<8x128xf32>, vector<128x384xf32>, vector<8x384xf32> -> vector<8x384xf32>
    %158 = vector.extract_strided_slice %14 {offsets = [40, 0], sizes = [8, 384], strides = [1, 1]} : vector<64x384xf32> to vector<8x384xf32>
    %159 = vector.extract_strided_slice %158 {offsets = [0, 0], sizes = [8, 128], strides = [1, 1]} : vector<8x384xf32> to vector<8x128xf32>
    %160 = vector.extract_strided_slice %157 {offsets = [0, 0], sizes = [8, 128], strides = [1, 1]} : vector<8x384xf32> to vector<8x128xf32>
    %161 = arith.addf %159, %160 : vector<8x128xf32>
    %162 = arith.negf %161 : vector<8x128xf32>
    %163 = math.exp %162 : vector<8x128xf32>
    %cst_27 = arith.constant 1.000000e+00 : f32
    %164 = vector.broadcast %cst_27 : f32 to vector<8x128xf32>
    %165 = arith.addf %164, %163 : vector<8x128xf32>
    %166 = arith.divf %164, %165 : vector<8x128xf32>
    %167 = vector.extract_strided_slice %158 {offsets = [0, 128], sizes = [8, 128], strides = [1, 1]} : vector<8x384xf32> to vector<8x128xf32>
    %168 = vector.extract_strided_slice %157 {offsets = [0, 128], sizes = [8, 128], strides = [1, 1]} : vector<8x384xf32> to vector<8x128xf32>
    %169 = arith.addf %167, %168 : vector<8x128xf32>
    %170 = arith.negf %169 : vector<8x128xf32>
    %171 = math.exp %170 : vector<8x128xf32>
    %cst_28 = arith.constant 1.000000e+00 : f32
    %172 = vector.broadcast %cst_28 : f32 to vector<8x128xf32>
    %173 = arith.addf %172, %171 : vector<8x128xf32>
    %174 = arith.divf %172, %173 : vector<8x128xf32>
    %175 = vector.extract_strided_slice %158 {offsets = [0, 256], sizes = [8, 128], strides = [1, 1]} : vector<8x384xf32> to vector<8x128xf32>
    %176 = vector.extract_strided_slice %157 {offsets = [0, 256], sizes = [8, 128], strides = [1, 1]} : vector<8x384xf32> to vector<8x128xf32>
    %177 = vector.broadcast %9 : vector<1x128xf32> to vector<8x128xf32>
    %178 = arith.addf %176, %177 : vector<8x128xf32>
    %179 = arith.mulf %166, %178 : vector<8x128xf32>
    %180 = arith.addf %175, %179 : vector<8x128xf32>
    %181 = math.tanh %180 : vector<8x128xf32>
    %cst_29 = arith.constant 1.000000e+00 : f32
    %182 = vector.broadcast %cst_29 : f32 to vector<8x128xf32>
    %183 = arith.subf %182, %174 : vector<8x128xf32>
    %184 = arith.mulf %183, %181 : vector<8x128xf32>
    %185 = arith.mulf %174, %156 : vector<8x128xf32>
    %186 = arith.addf %184, %185 : vector<8x128xf32>
    %cst_30 = arith.constant dense<0.000000e+00> : vector<8x384xf32>
    %187 = tpu.matmul %186, %15, %cst_30 {dimension_numbers = #tpu.dot_dimension_numbers<[1], [0], [0], [1], [0, 0, 1, 1], [], []>} : vector<8x128xf32>, vector<128x384xf32>, vector<8x384xf32> -> vector<8x384xf32>
    %188 = vector.extract_strided_slice %14 {offsets = [48, 0], sizes = [8, 384], strides = [1, 1]} : vector<64x384xf32> to vector<8x384xf32>
    %189 = vector.extract_strided_slice %188 {offsets = [0, 0], sizes = [8, 128], strides = [1, 1]} : vector<8x384xf32> to vector<8x128xf32>
    %190 = vector.extract_strided_slice %187 {offsets = [0, 0], sizes = [8, 128], strides = [1, 1]} : vector<8x384xf32> to vector<8x128xf32>
    %191 = arith.addf %189, %190 : vector<8x128xf32>
    %192 = arith.negf %191 : vector<8x128xf32>
    %193 = math.exp %192 : vector<8x128xf32>
    %cst_31 = arith.constant 1.000000e+00 : f32
    %194 = vector.broadcast %cst_31 : f32 to vector<8x128xf32>
    %195 = arith.addf %194, %193 : vector<8x128xf32>
    %196 = arith.divf %194, %195 : vector<8x128xf32>
    %197 = vector.extract_strided_slice %188 {offsets = [0, 128], sizes = [8, 128], strides = [1, 1]} : vector<8x384xf32> to vector<8x128xf32>
    %198 = vector.extract_strided_slice %187 {offsets = [0, 128], sizes = [8, 128], strides = [1, 1]} : vector<8x384xf32> to vector<8x128xf32>
    %199 = arith.addf %197, %198 : vector<8x128xf32>
    %200 = arith.negf %199 : vector<8x128xf32>
    %201 = math.exp %200 : vector<8x128xf32>
    %cst_32 = arith.constant 1.000000e+00 : f32
    %202 = vector.broadcast %cst_32 : f32 to vector<8x128xf32>
    %203 = arith.addf %202, %201 : vector<8x128xf32>
    %204 = arith.divf %202, %203 : vector<8x128xf32>
    %205 = vector.extract_strided_slice %188 {offsets = [0, 256], sizes = [8, 128], strides = [1, 1]} : vector<8x384xf32> to vector<8x128xf32>
    %206 = vector.extract_strided_slice %187 {offsets = [0, 256], sizes = [8, 128], strides = [1, 1]} : vector<8x384xf32> to vector<8x128xf32>
    %207 = vector.broadcast %9 : vector<1x128xf32> to vector<8x128xf32>
    %208 = arith.addf %206, %207 : vector<8x128xf32>
    %209 = arith.mulf %196, %208 : vector<8x128xf32>
    %210 = arith.addf %205, %209 : vector<8x128xf32>
    %211 = math.tanh %210 : vector<8x128xf32>
    %cst_33 = arith.constant 1.000000e+00 : f32
    %212 = vector.broadcast %cst_33 : f32 to vector<8x128xf32>
    %213 = arith.subf %212, %204 : vector<8x128xf32>
    %214 = arith.mulf %213, %211 : vector<8x128xf32>
    %215 = arith.mulf %204, %186 : vector<8x128xf32>
    %216 = arith.addf %214, %215 : vector<8x128xf32>
    %cst_34 = arith.constant dense<0.000000e+00> : vector<8x384xf32>
    %217 = tpu.matmul %216, %15, %cst_34 {dimension_numbers = #tpu.dot_dimension_numbers<[1], [0], [0], [1], [0, 0, 1, 1], [], []>} : vector<8x128xf32>, vector<128x384xf32>, vector<8x384xf32> -> vector<8x384xf32>
    %218 = vector.extract_strided_slice %14 {offsets = [56, 0], sizes = [8, 384], strides = [1, 1]} : vector<64x384xf32> to vector<8x384xf32>
    %219 = vector.extract_strided_slice %218 {offsets = [0, 0], sizes = [8, 128], strides = [1, 1]} : vector<8x384xf32> to vector<8x128xf32>
    %220 = vector.extract_strided_slice %217 {offsets = [0, 0], sizes = [8, 128], strides = [1, 1]} : vector<8x384xf32> to vector<8x128xf32>
    %221 = arith.addf %219, %220 : vector<8x128xf32>
    %222 = arith.negf %221 : vector<8x128xf32>
    %223 = math.exp %222 : vector<8x128xf32>
    %cst_35 = arith.constant 1.000000e+00 : f32
    %224 = vector.broadcast %cst_35 : f32 to vector<8x128xf32>
    %225 = arith.addf %224, %223 : vector<8x128xf32>
    %226 = arith.divf %224, %225 : vector<8x128xf32>
    %227 = vector.extract_strided_slice %218 {offsets = [0, 128], sizes = [8, 128], strides = [1, 1]} : vector<8x384xf32> to vector<8x128xf32>
    %228 = vector.extract_strided_slice %217 {offsets = [0, 128], sizes = [8, 128], strides = [1, 1]} : vector<8x384xf32> to vector<8x128xf32>
    %229 = arith.addf %227, %228 : vector<8x128xf32>
    %230 = arith.negf %229 : vector<8x128xf32>
    %231 = math.exp %230 : vector<8x128xf32>
    %cst_36 = arith.constant 1.000000e+00 : f32
    %232 = vector.broadcast %cst_36 : f32 to vector<8x128xf32>
    %233 = arith.addf %232, %231 : vector<8x128xf32>
    %234 = arith.divf %232, %233 : vector<8x128xf32>
    %235 = vector.extract_strided_slice %218 {offsets = [0, 256], sizes = [8, 128], strides = [1, 1]} : vector<8x384xf32> to vector<8x128xf32>
    %236 = vector.extract_strided_slice %217 {offsets = [0, 256], sizes = [8, 128], strides = [1, 1]} : vector<8x384xf32> to vector<8x128xf32>
    %237 = vector.broadcast %9 : vector<1x128xf32> to vector<8x128xf32>
    %238 = arith.addf %236, %237 : vector<8x128xf32>
    %239 = arith.mulf %226, %238 : vector<8x128xf32>
    %240 = arith.addf %235, %239 : vector<8x128xf32>
    %241 = math.tanh %240 : vector<8x128xf32>
    %cst_37 = arith.constant 1.000000e+00 : f32
    %242 = vector.broadcast %cst_37 : f32 to vector<8x128xf32>
    %243 = arith.subf %242, %234 : vector<8x128xf32>
    %244 = arith.mulf %243, %241 : vector<8x128xf32>
    %245 = arith.mulf %234, %216 : vector<8x128xf32>
    %246 = arith.addf %244, %245 : vector<8x128xf32>
    %c0_i32_38 = arith.constant 0 : i32
    %247 = tpu.memref_slice %arg15[%c0_i32_38] : memref<4x!tpu.dma_semaphore, #tpu.memory_space<semaphore_mem>> -> memref<1x!tpu.dma_semaphore, #tpu.memory_space<semaphore_mem>>
    %248 = tpu.memref_squeeze %247 : memref<1x!tpu.dma_semaphore, #tpu.memory_space<semaphore_mem>> -> memref<!tpu.dma_semaphore, #tpu.memory_space<semaphore_mem>>
    tpu.wait_dma2 semaphore(%248 : memref<!tpu.dma_semaphore, #tpu.memory_space<semaphore_mem>>) src(%arg6 : memref<16x256xbf16, #tpu.memory_space<any>>) dst(%arg11 : memref<16x256xbf16, #tpu.memory_space<vmem>>)
    %c1_i32_39 = arith.constant 1 : i32
    %249 = tpu.memref_slice %arg15[%c1_i32_39] : memref<4x!tpu.dma_semaphore, #tpu.memory_space<semaphore_mem>> -> memref<1x!tpu.dma_semaphore, #tpu.memory_space<semaphore_mem>>
    %250 = tpu.memref_squeeze %249 : memref<1x!tpu.dma_semaphore, #tpu.memory_space<semaphore_mem>> -> memref<!tpu.dma_semaphore, #tpu.memory_space<semaphore_mem>>
    tpu.wait_dma2 semaphore(%250 : memref<!tpu.dma_semaphore, #tpu.memory_space<semaphore_mem>>) src(%arg7 : memref<128x256xbf16, #tpu.memory_space<any>>) dst(%arg12 : memref<128x256xbf16, #tpu.memory_space<vmem>>)
    %c0_40 = arith.constant 0 : index
    %c0_41 = arith.constant 0 : index
    %251 = vector.load %arg1[%c0_40, %c0_41] : memref<8x16xf32, #tpu.memory_space<vmem>>, vector<8x16xf32>
    %252 = arith.truncf %251 : vector<8x16xf32> to vector<8x16xbf16>
    %c0_42 = arith.constant 0 : index
    %c0_43 = arith.constant 0 : index
    %253 = vector.load %arg11[%c0_42, %c0_43] : memref<16x256xbf16, #tpu.memory_space<vmem>>, vector<16x256xbf16>
    %cst_44 = arith.constant dense<0.000000e+00> : vector<8x256xf32>
    %254 = tpu.matmul %252, %253, %cst_44 {dimension_numbers = #tpu.dot_dimension_numbers<[1], [0], [0], [1], [0, 0, 1, 1], [], []>} : vector<8x16xbf16>, vector<16x256xbf16>, vector<8x256xf32> -> vector<8x256xf32>
    %255 = arith.truncf %246 : vector<8x128xf32> to vector<8x128xbf16>
    %c0_45 = arith.constant 0 : index
    %c0_46 = arith.constant 0 : index
    %256 = vector.load %arg12[%c0_45, %c0_46] : memref<128x256xbf16, #tpu.memory_space<vmem>>, vector<128x256xbf16>
    %cst_47 = arith.constant dense<0.000000e+00> : vector<8x256xf32>
    %257 = tpu.matmul %255, %256, %cst_47 {dimension_numbers = #tpu.dot_dimension_numbers<[1], [0], [0], [1], [0, 0, 1, 1], [], []>} : vector<8x128xbf16>, vector<128x256xbf16>, vector<8x256xf32> -> vector<8x256xf32>
    %258 = arith.addf %254, %257 : vector<8x256xf32>
    %c0_48 = arith.constant 0 : index
    %c0_49 = arith.constant 0 : index
    %259 = vector.load %arg5[%c0_48, %c0_49] : memref<3x256xf32, #tpu.memory_space<vmem>>, vector<1x256xf32>
    %260 = vector.broadcast %259 : vector<1x256xf32> to vector<8x256xf32>
    %261 = arith.addf %258, %260 : vector<8x256xf32>
    %cst_50 = arith.constant 0.000000e+00 : f32
    %262 = vector.broadcast %cst_50 : f32 to vector<8x256xf32>
    %263 = arith.maximumf %261, %262 : vector<8x256xf32>
    %c2_i32_51 = arith.constant 2 : i32
    %264 = tpu.memref_slice %arg15[%c2_i32_51] : memref<4x!tpu.dma_semaphore, #tpu.memory_space<semaphore_mem>> -> memref<1x!tpu.dma_semaphore, #tpu.memory_space<semaphore_mem>>
    %265 = tpu.memref_squeeze %264 : memref<1x!tpu.dma_semaphore, #tpu.memory_space<semaphore_mem>> -> memref<!tpu.dma_semaphore, #tpu.memory_space<semaphore_mem>>
    tpu.wait_dma2 semaphore(%265 : memref<!tpu.dma_semaphore, #tpu.memory_space<semaphore_mem>>) src(%arg8 : memref<256x256xbf16, #tpu.memory_space<any>>) dst(%arg13 : memref<256x256xbf16, #tpu.memory_space<vmem>>)
    %266 = arith.truncf %263 : vector<8x256xf32> to vector<8x256xbf16>
    %c0_52 = arith.constant 0 : index
    %c0_53 = arith.constant 0 : index
    %267 = vector.load %arg13[%c0_52, %c0_53] : memref<256x256xbf16, #tpu.memory_space<vmem>>, vector<256x256xbf16>
    %cst_54 = arith.constant dense<0.000000e+00> : vector<8x256xf32>
    %268 = tpu.matmul %266, %267, %cst_54 {dimension_numbers = #tpu.dot_dimension_numbers<[1], [0], [0], [1], [0, 0, 1, 1], [], []>} : vector<8x256xbf16>, vector<256x256xbf16>, vector<8x256xf32> -> vector<8x256xf32>
    %c1_55 = arith.constant 1 : index
    %c0_56 = arith.constant 0 : index
    %269 = vector.load %arg5[%c1_55, %c0_56] : memref<3x256xf32, #tpu.memory_space<vmem>>, vector<1x256xf32>
    %270 = vector.broadcast %269 : vector<1x256xf32> to vector<8x256xf32>
    %271 = arith.addf %268, %270 : vector<8x256xf32>
    %cst_57 = arith.constant 0.000000e+00 : f32
    %272 = vector.broadcast %cst_57 : f32 to vector<8x256xf32>
    %273 = arith.maximumf %271, %272 : vector<8x256xf32>
    %c3_i32_58 = arith.constant 3 : i32
    %274 = tpu.memref_slice %arg15[%c3_i32_58] : memref<4x!tpu.dma_semaphore, #tpu.memory_space<semaphore_mem>> -> memref<1x!tpu.dma_semaphore, #tpu.memory_space<semaphore_mem>>
    %275 = tpu.memref_squeeze %274 : memref<1x!tpu.dma_semaphore, #tpu.memory_space<semaphore_mem>> -> memref<!tpu.dma_semaphore, #tpu.memory_space<semaphore_mem>>
    tpu.wait_dma2 semaphore(%275 : memref<!tpu.dma_semaphore, #tpu.memory_space<semaphore_mem>>) src(%arg9 : memref<256x128xbf16, #tpu.memory_space<any>>) dst(%arg14 : memref<256x128xbf16, #tpu.memory_space<vmem>>)
    %276 = arith.truncf %273 : vector<8x256xf32> to vector<8x256xbf16>
    %c0_59 = arith.constant 0 : index
    %c0_60 = arith.constant 0 : index
    %277 = vector.load %arg14[%c0_59, %c0_60] : memref<256x128xbf16, #tpu.memory_space<vmem>>, vector<256x128xbf16>
    %cst_61 = arith.constant dense<0.000000e+00> : vector<8x128xf32>
    %278 = tpu.matmul %276, %277, %cst_61 {dimension_numbers = #tpu.dot_dimension_numbers<[1], [0], [0], [1], [0, 0, 1, 1], [], []>} : vector<8x256xbf16>, vector<256x128xbf16>, vector<8x128xf32> -> vector<8x128xf32>
    %c2 = arith.constant 2 : index
    %c0_62 = arith.constant 0 : index
    %279 = vector.load %arg5[%c2, %c0_62] : memref<3x256xf32, #tpu.memory_space<vmem>>, vector<1x128xf32>
    %280 = vector.broadcast %279 : vector<1x128xf32> to vector<8x128xf32>
    %281 = arith.addf %278, %280 : vector<8x128xf32>
    %282 = math.tanh %281 : vector<8x128xf32>
    %cst_63 = arith.constant 2.000000e+00 : f32
    %283 = vector.broadcast %cst_63 : f32 to vector<8x128xf32>
    %284 = arith.mulf %283, %282 : vector<8x128xf32>
    %c0_64 = arith.constant 0 : index
    %c0_65 = arith.constant 0 : index
    %285 = vector.load %arg10[%c0_64, %c0_65] : memref<8x128xf32, #tpu.memory_space<vmem>>, vector<8x128xf32>
    tpu.vector_store %arg10[%c0_64, %c0_65], %284 {strides = array<i32>} : memref<8x128xf32, #tpu.memory_space<vmem>>, vector<8x128xf32>,
    return
  }
}

</mosaic_0001>

<bundles_post_ra>
// kernel: tpu_custom_call.1
= control target key start
LH: loop header
LB: loop body
LE: loop exit
PB: predicated region body
PF: predicated region fallthrough
CT: control target
= control target key end

     0   :  { %15 = vsyncpa [#allocation8], 0  ;;  %s3314_s0 = inlined_call_operand.vmem [shape: f32[64,21], index: 0, kind: input, shape index: {}]   ;;  %s3315_s1 = inlined_call_operand.hbm [shape: f32[8,16], index: 1, kind: input, shape index: {}]   ;;  %s3316_s2 = inlined_call_operand.vmem [shape: f32[21,384], index: 2, kind: input, shape index: {}]   ;;  %s3317_s3 = inlined_call_operand.hbm [shape: f32[128,384], index: 3, kind: input, shape index: {}]   ;;  %s3318_s4 = inlined_call_operand.hbm [shape: f32[2,384], index: 4, kind: input, shape index: {}]   ;;  %s3319_s5 = inlined_call_operand.hbm [shape: f32[3,256], index: 5, kind: input, shape index: {}]   ;;  %s3320_s6 = inlined_call_operand.vmem [shape: bf16[16,256], index: 6, kind: input, shape index: {}]   ;;  %s3321_s7 = inlined_call_operand.hbm [shape: bf16[128,256], index: 7, kind: input, shape index: {}]   ;;  %s3322_s8 = inlined_call_operand.hbm [shape: bf16[256,256], index: 8, kind: input, shape index: {}]   ;;  %s3323_s9 = inlined_call_operand.hbm [shape: bf16[256,128], index: 9, kind: input, shape index: {}]   ;;  %s3324_s10 = inlined_call_operand.hbm [shape: f32[8,128], index: 10, kind: output, shape index: {}]  }
   0x1   :  { %16 = vsyncpa [#allocation11], 0 }
   0x2   :  { %17 = vsyncpa [#allocation14], 0  ;;  %s38_s15 = sshll.u32 %s3317_s3, 4  ;;  %s39_s15 = int_to_ptr.hbm [resolvable:$true] %s38_s15 }
   0x3   :  { %18 = vsyncpa [#allocation9], 0  ;;  %s2561_s16 = smov [#allocation10]   ;;  %s26_s20 = sshll.u32 %s3315_s1, 4  ;;  %s27_s20 = int_to_ptr.hbm [resolvable:$true] %s26_s20 }
   0x4   :  { %s40_s17 = sshll.u32 %s2561_s16, 4  ;;  %s2562_s21 = smov 384   ;;  %s41_s17 = int_to_ptr.vmem [resolvable:$true] %s40_s17 }
   0x5   :  { %s2563_s22 = smov 24   ;;  %s2564_s23 = smov [#allocation7]  }
   0x6   :  { %46 = dma.hbm_to_vmem [thread:$0]  %s39_s15, 6144, %s41_s17, [#allocation11], %s2562_s21, %s2562_s21, %s2563_s22  }
   0x7   :  { %s28_s24 = sshll.u32 %s2564_s23, 4  ;;  %s52_s27 = sshll.u32 %s3318_s4, 4  ;;  %s29_s24 = int_to_ptr.vmem [resolvable:$true] %s28_s24  ;;  %s53_s27 = int_to_ptr.hbm [resolvable:$true] %s52_s27 }
   0x8   :  { %31 = dma.hbm_to_vmem [thread:$0]  %s27_s20, 128, %s29_s24, [#allocation8]  }
   0x9   :  { %s63_s29 = sshll.u32 %s3319_s5, 4  ;;  %s2565_s30 = smov [#allocation12]   ;;  %s64_s29 = int_to_ptr.hbm [resolvable:$true] %s63_s29 }
   0xa   :  { %s54_s11 = sshll.u32 %s2565_s30, 4  ;;  %s2566_s1 = smov [#allocation13]   ;;  %s55_s11 = int_to_ptr.vmem [resolvable:$true] %s54_s11 }
   0xb   :  { %57 = dma.hbm_to_vmem [thread:$0]  %s53_s27, 96, %s55_s11, [#allocation11]  }
   0xc   :  { %s65_s12 = sshll.u32 %s2566_s1, 4  ;;  %s66_s12 = int_to_ptr.vmem [resolvable:$true] %s65_s12 }
   0xd   :  { %68 = dma.hbm_to_vmem [thread:$0]  %s64_s29, 128, %s66_s12, [#allocation14]  }
   0xe   :  { %2545 = dma.done.wait [#allocation8], 128  }
   0xf   :  { %2546 = vsyncadd [#allocation8], 4294967168 }
  0x10   :  { %2547 = dma.done.wait [#allocation11], 6240  }
  0x11   :  { %2548 = vsyncadd [#allocation11], 4294961056 }
  0x12   :  { %2549 = dma.done.wait [#allocation14], 128  }
  0x13   :  { %2550 = vsyncadd [#allocation14], 4294967168  ;;  %v96_v0 = vld [vmem:[%s3320_s6] sm:$0xff]  ;;  %v98_v1 = vld [vmem:[%s3320_s6 + $0x8] sm:$0xff]  ;;  %vm199_vm0 = vcmask 1044480   ;;  %vm174_vm1 = vcmask 171008  }
  0x14   :  { %97 = vst [vmem:[#allocation2] sm:$0xff] %v96_v0  ;;  %v164_v2 = vld [vmem:[%s3316_s2 + $0x30] sm:$0x1f]  ;;  %v165_v3 = vld [vmem:[%s3316_s2 + $0x38] sm:$0x1f]  ;;  %v162_v5 = vld [vmem:[%s3316_s2 + $0x20] sm:$0xff] }
  0x15   :  { %99 = vst [vmem:[#allocation2 + $0x8] sm:$0xff] %v98_v1  ;;  %v161_v4 = vld [vmem:[%s3316_s2 + $0x18] sm:$0xff]  ;;  %1838 = vmatpush.msk.msra.mxu0 %vm199_vm0, %v164_v2  ;;  %1847 = vmatpush.msk.msra.mxu1 %vm199_vm0, %v165_v3  ;;  %v158_v6 = vld [vmem:[%s3316_s2] sm:$0xff]  ;;  %v159_v7 = vld [vmem:[%s3316_s2 + $0x8] sm:$0xff] }
  0x16   :  { %v166_v8 = vld [vmem:[%s3316_s2 + $0x40] sm:$0x1f]  ;;  %2217 = vmatpush.msk.msra.mxu3 %vm199_vm0, %v165_v3  ;;  %v163_v10 = vld [vmem:[%s3316_s2 + $0x28] sm:$0xff]  ;;  %v160_v12 = vld [vmem:[%s3316_s2 + $0x10] sm:$0xff] }
  0x17   :  { %223 = vmatpush.msra.mxu0 %v161_v4  ;;  %264 = vmatpush.msra.mxu1 %v162_v5  ;;  %v150_v9 = vld [vmem:[%s3314_s0] sm:$0xff] }
  0x18   :  { %1856 = vmatpush.msk.msra.mxu2 %vm199_vm0, %v166_v8  ;;  %2218 = vmatpush.msra.mxu3 %v162_v5  ;;  %v2671_v11 = vld [vmem:[#allocation10 + $0x168] sm:$0xff] }
  0x19   :  { %224 = vmatpush.msra.mxu0 %v158_v6  ;;  %265 = vmatpush.msra.mxu1 %v159_v7 }
  0x1a   :  { %1839 = vmatmul.msk.f32.vlgmr.msra.gmra.mxu0 %vm174_vm1, %v150_v9  ;;  %1848 = vmatmul.msk.f32.vlgmr.msra.gmra.mxu1 %vm174_vm1, %v150_v9 }
  0x1b   :  { %105 = vsyncadd [#allocation6], 256  ;;  %305 = vmatpush.msra.mxu2 %v163_v10  ;;  %2219 = vmatpush.msra.mxu3 %v159_v7  ;;  %v2678_v13 = vld [vmem:[#allocation10 + $0x150] sm:$0xff]  ;;  %v2682_v14 = vld [vmem:[#allocation10 + $0x138] sm:$0xff]  ;;  %s114_s23 = sshll.u32 %s3321_s7, 4  ;;  %s2567_s24 = smov [#allocation3]   ;;  %s115_s23 = int_to_ptr.hbm [resolvable:$true] %s114_s23 }
  0x1c   :  { %532 = vmatpush.msrb.mxu1 %v2671_v11  ;;  %v151_v15 = vld [vmem:[%s3314_s0 + $0x8] sm:$0xff]  ;;  %v2689_v16 = vld [vmem:[#allocation10 + $0x120] sm:$0xff]  ;;  %v2693_v17 = vld [vmem:[#allocation10 + $0x108] sm:$0xff]  ;;  %s116_s25 = sshll.u32 %s2567_s24, 4  ;;  %s128_s3 = sshll.u32 %s3322_s8, 4  ;;  %s117_s25 = int_to_ptr.vmem [resolvable:$true] %s116_s25  ;;  %s129_s3 = int_to_ptr.hbm [resolvable:$true] %s128_s3 }
  0x1d   :  { %424 = vmatpush.msrb.mxu3 %v2671_v11  ;;  %306 = vmatpush.msra.mxu2 %v160_v12  ;;  %v152_v18 = vld [vmem:[%s3314_s0 + $0x10] sm:$0xff]  ;;  %v2709_v19 = vld [vmem:[#allocation10 + $0xf0] sm:$0xff]  ;;  %v153_v21 = vld [vmem:[%s3314_s0 + $0x18] sm:$0xff]  ;;  %119 = dma.hbm_to_vmem [thread:$0]  %s115_s23, 2048, %s117_s25, [#allocation6 + $0x1] }
  0x1e   :  { %1857 = vmatmul.msk.f32.vlgmr.msra.gmra.mxu2 %vm174_vm1, %v150_v9  ;;  %533 = vmatpush.msrb.mxu1 %v2678_v13  ;;  %v2713_v20 = vld [vmem:[#allocation10 + $0xd8] sm:$0xff]  ;;  %v2720_v22 = vld [vmem:[#allocation10 + $0xc0] sm:$0xff]  ;;  %v2724_v23 = vld [vmem:[#allocation10 + $0xa8] sm:$0xff]  ;;  %s2568_s28 = smov [#allocation4]   ;;  %s142_s1 = sshll.u32 %s3323_s9, 4  ;;  %s143_s1 = int_to_ptr.hbm [resolvable:$true] %s142_s1 }
  0x1f   :  { %425 = vmatpush.msrb.mxu3 %v2678_v13  ;;  %3353 = vst [vmem:[#allocation33_spill] sm:$0xff] %v2713_v20  ;;  %v2730_v24 = vld [vmem:[#allocation10 + $0x90] sm:$0xff]  ;;  %v2734_v25 = vld [vmem:[#allocation10 + $0x78] sm:$0xff]  ;;  %v154_v26 = vld [vmem:[%s3314_s0 + $0x20] sm:$0xff]  ;;  %s130_s29 = sshll.u32 %s2568_s28, 4  ;;  %s2569_s7 = smov [#allocation5]   ;;  %s131_s29 = int_to_ptr.vmem [resolvable:$true] %s130_s29 }
  0x20   :  { %534 = vmatpush.msrb.mxu1 %v2682_v14  ;;  %v2741_v27 = vld [vmem:[#allocation10 + $0x60] sm:$0xff]  ;;  %1852 = vmatmul.msk.f32.vlgmr.msra.gmra.mxu3 %vm174_vm1, %v154_v26  ;;  %v2746_v28 = vld [vmem:[#allocation10 + $0x178] sm:$0xff]  ;;  %v2750_v29 = vld [vmem:[#allocation10 + $0x48] sm:$0xff]  ;;  %133 = dma.hbm_to_vmem [thread:$0]  %s129_s3, 4096, %s131_s29, [#allocation6 + $0x2] }
  0x21   :  { %426 = vmatpush.msrb.mxu3 %v2682_v14  ;;  %464 = vmatpush.msrb.mxu0 %v2746_v28  ;;  %v2752_v30 = vld [vmem:[#allocation10 + $0x160] sm:$0xff]  ;;  %v2758_v31 = vld [vmem:[#allocation10 + $0x30] sm:$0xff]  ;;  %v2760_v32 = vld [vmem:[#allocation10 + $0x148] sm:$0xff]  ;;  %s144_s12 = sshll.u32 %s2569_s7, 4  ;;  %s145_s12 = int_to_ptr.vmem [resolvable:$true] %s144_s12 }
  0x22   :  { %1840 = vmatmul.msk.f32.gmra.mxu0 %vm174_vm1, %v151_v15  ;;  %1849 = vmatmul.msk.f32.gmra.mxu1 %vm174_vm1, %v151_v15  ;;  %3354 = vst [vmem:[#allocation34_spill] sm:$0xff] %v2758_v31  ;;  %v2765_v33 = vld [vmem:[#allocation10 + $0x18] sm:$0xff]  ;;  %v2767_v34 = vld [vmem:[#allocation10 + $0x130] sm:$0xff]  ;;  %v2775_v36 = vld [vmem:[#allocation10] sm:$0xff]  ;;  %147 = dma.hbm_to_vmem [thread:$0]  %s143_s1, 2048, %s145_s12, [#allocation6 + $0x3] }
  0x23   :  { %427 = vmatpush.msrb.mxu3 %v2689_v16  ;;  %535 = vmatpush.msrb.mxu1 %v2689_v16  ;;  %3355 = vst [vmem:[#allocation35_spill] sm:$0xff] %v2765_v33  ;;  %v155_v35 = vld [vmem:[%s3314_s0 + $0x28] sm:$0xff]  ;;  %v2781_v38 = vld [vmem:[#allocation10 + $0x118] sm:$0xff]  ;;  %v2788_v40 = vld [vmem:[#allocation10 + $0x100] sm:$0xff] }
  0x24   :  { %465 = vmatpush.msrb.mxu0 %v2752_v30  ;;  %3356 = vst [vmem:[#allocation36_spill] sm:$0xff] %v2775_v36  ;;  %v2779_v37 = vld [vmem:[#allocation10 + $0x170] sm:$0xff]  ;;  %v2786_v39 = vld [vmem:[#allocation10 + $0x158] sm:$0xff]  ;;  %v2793_v41 = vld [vmem:[#allocation12] ss:$2 sm:$0x7] }
  0x25   :  { %428 = vmatpush.msrb.mxu3 %v2693_v17  ;;  %536 = vmatpush.msrb.mxu1 %v2693_v17  ;;  %v2796_v42 = vld [vmem:[#allocation10 + $0x140] sm:$0xff]  ;;  %v2798_v43 = vld [vmem:[#allocation10 + $0xe8] sm:$0xff]  ;;  %v2804_v45 = vld [vmem:[#allocation10 + $0xd0] sm:$0xff]  ;;  %v2819_v49 = vperm.slane %v2793_v41, 0  ;;  %v2822_v50 = vperm.slane %v2793_v41, 1 }
  0x26   :  { %1858 = vmatmul.msk.f32.gmra.mxu2 %vm174_vm1, %v151_v15  ;;  %466 = vmatpush.msrb.mxu0 %v2760_v32  ;;  %v2802_v44 = vld [vmem:[#allocation10 + $0x128] sm:$0xff]  ;;  %v156_v46 = vld [vmem:[%s3314_s0 + $0x30] sm:$0xff]  ;;  %v2815_v48 = vld [vmem:[#allocation10 + $0x110] sm:$0xff] }
  0x27   :  { %429 = vmatpush.msrb.mxu3 %v2709_v19  ;;  %537 = vmatpush.msrb.mxu1 %v2709_v19  ;;  %v2811_v47 = vld [vmem:[#allocation10 + $0xb8] sm:$0xff]  ;;  %3357 = vst [vmem:[#allocation37_spill] sm:$0xff] %v2819_v49  ;;  %v2831_v52 = vld [vmem:[#allocation10 + $0xa0] sm:$0xff]  ;;  %v2841_v58 = vld [vmem:[#allocation10 + $0x88] sm:$0xff] }
  0x28   :  { %467 = vmatpush.msrb.mxu0 %v2767_v34  ;;  %1853 = vmatmul.msk.f32.gmra.mxu3 %vm174_vm1, %v155_v35  ;;  %3358 = vst [vmem:[#allocation38_spill] sm:$0xff] %v2822_v50  ;;  %v2829_v51 = vld [vmem:[#allocation10 + $0xf8] sm:$0xff]  ;;  %v2839_v57 = vld [vmem:[#allocation10 + $0xe0] sm:$0xff]  ;;  %v2847_v61 = vld [vmem:[#allocation10 + $0xc8] sm:$0xff] }
  0x29   :  { %430 = vmatpush.msrb.mxu3 %v2713_v20  ;;  %538 = vmatpush.msrb.mxu1 %v2713_v20  ;;  %v2849_v62 = vld [vmem:[#allocation10 + $0x70] sm:$0xff]  ;;  %v157_v63 = vld [vmem:[%s3314_s0 + $0x38] sm:$0xff]  ;;  %v2858_v1 = vld [vmem:[#allocation10 + $0x58] sm:$0xff] }
  0x2a   :  { %1841 = vmatmul.msk.f32.gmra.mxu0 %vm174_vm1, %v152_v18  ;;  %1850 = vmatmul.msk.f32.gmra.mxu1 %vm174_vm1, %v152_v18  ;;  %v2856_v0 = vld [vmem:[#allocation10 + $0xb0] sm:$0xff]  ;;  %v2863_v2 = vld [vmem:[#allocation10 + $0x40] sm:$0xff]  ;;  %v2867_v3 = vld [vmem:[#allocation10 + $0x98] sm:$0xff] }
  0x2b   :  { %431 = vmatpush.msrb.mxu3 %v2720_v22  ;;  %539 = vmatpush.msrb.mxu1 %v2720_v22  ;;  %3359 = vst [vmem:[#allocation39_spill] sm:$0xff] %v2863_v2  ;;  %v2870_v4 = vld [vmem:[#allocation10 + $0x28] sm:$0xff]  ;;  %v2874_v5 = vld [vmem:[#allocation10 + $0x80] sm:$0xff]  ;;  %v2878_v6 = vld [vmem:[#allocation10 + $0x10] sm:$0xff] }
  0x2c   :  { %468 = vmatpush.msrb.mxu0 %v2781_v38  ;;  %552 = vmatpush.msrb.mxu2 %v2779_v37  ;;  %3360 = vst [vmem:[#allocation40_spill] sm:$0xff] %v2870_v4  ;;  %v2882_v7 = vld [vmem:[#allocation10 + $0x68] sm:$0xff]  ;;  %v2888_v12 = vld [vmem:[#allocation10 + $0x50] sm:$0xff] }
  0x2d   :  { %432 = vmatpush.msrb.mxu3 %v2724_v23  ;;  %540 = vmatpush.msrb.mxu1 %v2724_v23  ;;  %3361 = vst [vmem:[#allocation41_spill] sm:$0xff] %v2878_v6 }
  0x2e   :  { %1859 = vmatmul.msk.f32.gmra.mxu2 %vm174_vm1, %v152_v18  ;;  %469 = vmatpush.msrb.mxu0 %v2788_v40  ;;  %3362 = vst [vmem:[#allocation42_spill] sm:$0xff] %v2888_v12  ;;  %v2895_v18 = vld [vmem:[#allocation10 + $0x38] sm:$0xff] }
  0x2f   :  { %433 = vmatpush.msrb.mxu3 %v2730_v24  ;;  %541 = vmatpush.msrb.mxu1 %v2730_v24  ;;  %3363 = vst [vmem:[#allocation43_spill] sm:$0xff] %v2895_v18 }
  0x30   :  { %553 = vmatpush.msrb.mxu2 %v2786_v39  ;;  %470 = vmatpush.msrb.mxu0 %v2798_v43 }
  0x31   :  { %434 = vmatpush.msrb.mxu3 %v2734_v25  ;;  %542 = vmatpush.msrb.mxu1 %v2734_v25 }
  0x32   :  { %1842 = vmatmul.msk.f32.gmra.mxu0 %vm174_vm1, %v153_v21  ;;  %1851 = vmatmul.msk.f32.gmra.mxu1 %vm174_vm1, %v153_v21 }
  0x33   :  { %435 = vmatpush.msrb.mxu3 %v2741_v27  ;;  %543 = vmatpush.msrb.mxu1 %v2741_v27 }
  0x34   :  { %554 = vmatpush.msrb.mxu2 %v2796_v42  ;;  %471 = vmatpush.msrb.mxu0 %v2804_v45 }
  0x35   :  { %436 = vmatpush.msrb.mxu3 %v2750_v29  ;;  %544 = vmatpush.msrb.mxu1 %v2750_v29 }
  0x36   :  { %1860 = vmatmul.msk.f32.gmra.mxu2 %vm174_vm1, %v153_v21  ;;  %1854 = vmatmul.msk.f32.gmra.mxu3 %vm174_vm1, %v156_v46  ;;  %v2902_v21 = vld [vmem:[#allocation10 + $0x20] sm:$0xff] }
  0x37   :  { %437 = vmatpush.msrb.mxu3 %v2758_v31  ;;  %545 = vmatpush.msrb.mxu1 %v2758_v31  ;;  %3364 = vst [vmem:[#allocation44_spill] sm:$0xff] %v2902_v21 }
  0x38   :  { %472 = vmatpush.msrb.mxu0 %v2811_v47  ;;  %555 = vmatpush.msrb.mxu2 %v2802_v44 }
  0x39   :  { %438 = vmatpush.msrb.mxu3 %v2765_v33  ;;  %546 = vmatpush.msrb.mxu1 %v2765_v33 }
  0x3a   :  { %1843 = vmatmul.msk.f32.gmra.mxu0 %vm174_vm1, %v154_v26  ;;  %556 = vmatpush.msrb.mxu2 %v2815_v48 }
  0x3b   :  { %439 = vmatpush.msrb.mxu3 %v2775_v36  ;;  %547 = vmatpush.msrb.mxu1 %v2775_v36 }
  0x3c   :  { %473 = vmatpush.msrb.mxu0 %v2831_v52  ;;  %557 = vmatpush.msrb.mxu2 %v2829_v51 }
  0x3d   :  { %444 = vmatpush.msra.mxu3 %v2779_v37  ;;  %660 = vmatpush.msra.mxu1 %v2779_v37 }
  0x3e   :  { %1861 = vmatmul.msk.f32.gmra.mxu2 %vm174_vm1, %v154_v26  ;;  %474 = vmatpush.msrb.mxu0 %v2841_v58  ;;  %v2908_v26 = vld [vmem:[#allocation10 + $0x8] sm:$0xff] }
  0x3f   :  { %445 = vmatpush.msra.mxu3 %v2786_v39  ;;  %661 = vmatpush.msra.mxu1 %v2786_v39  ;;  %3365 = vst [vmem:[#allocation45_spill] sm:$0xff] %v2908_v26 }
  0x40   :  { %475 = vmatpush.msrb.mxu0 %v2849_v62  ;;  %1855 = vmatmul.msk.f32.gmra.mxu3 %vm174_vm1, %v157_v63 }
  0x41   :  { %446 = vmatpush.msra.mxu3 %v2796_v42  ;;  %558 = vmatpush.msrb.mxu2 %v2839_v57 }
  0x42   :  { %1844 = vmatmul.msk.f32.gmra.mxu0 %vm174_vm1, %v155_v35  ;;  %662 = vmatpush.msra.mxu1 %v2796_v42 }
  0x43   :  { %447 = vmatpush.msra.mxu3 %v2802_v44  ;;  %476 = vmatpush.msrb.mxu0 %v2858_v1 }
  0x44   :  { %559 = vmatpush.msrb.mxu2 %v2847_v61  ;;  %663 = vmatpush.msra.mxu1 %v2802_v44 }
  0x45   :  { %448 = vmatpush.msra.mxu3 %v2815_v48  ;;  %477 = vmatpush.msrb.mxu0 %v2863_v2 }
  0x46   :  { %1862 = vmatmul.msk.f32.gmra.mxu2 %vm174_vm1, %v155_v35  ;;  %664 = vmatpush.msra.mxu1 %v2815_v48 }
  0x47   :  { %449 = vmatpush.msra.mxu3 %v2829_v51  ;;  %478 = vmatpush.msrb.mxu0 %v2870_v4 }
  0x48   :  { %560 = vmatpush.msrb.mxu2 %v2856_v0  ;;  %665 = vmatpush.msra.mxu1 %v2829_v51 }
  0x49   :  { %450 = vmatpush.msra.mxu3 %v2839_v57  ;;  %479 = vmatpush.msrb.mxu0 %v2878_v6 }
  0x4a   :  { %1845 = vmatmul.msk.f32.gmra.mxu0 %vm174_vm1, %v156_v46  ;;  %561 = vmatpush.msrb.mxu2 %v2867_v3 }
  0x4b   :  { %451 = vmatpush.msra.mxu3 %v2847_v61  ;;  %640 = vmatpush.msra.mxu0 %v2671_v11 }
  0x4c   :  { %562 = vmatpush.msrb.mxu2 %v2874_v5  ;;  %666 = vmatpush.msra.mxu1 %v2839_v57 }
  0x4d   :  { %452 = vmatpush.msra.mxu3 %v2856_v0  ;;  %641 = vmatpush.msra.mxu0 %v2678_v13 }
  0x4e   :  { %1863 = vmatmul.msk.f32.gmra.mxu2 %vm174_vm1, %v156_v46  ;;  %667 = vmatpush.msra.mxu1 %v2847_v61 }
  0x4f   :  { %453 = vmatpush.msra.mxu3 %v2867_v3  ;;  %563 = vmatpush.msrb.mxu2 %v2882_v7 }
  0x50   :  { %642 = vmatpush.msra.mxu0 %v2682_v14  ;;  %668 = vmatpush.msra.mxu1 %v2856_v0 }
  0x51   :  { %454 = vmatpush.msra.mxu3 %v2874_v5  ;;  %564 = vmatpush.msrb.mxu2 %v2888_v12 }
  0x52   :  { %1846 = vmatmul.msk.f32.gmra.mxu0 %vm174_vm1, %v157_v63  ;;  %669 = vmatpush.msra.mxu1 %v2867_v3 }
  0x53   :  { %455 = vmatpush.msra.mxu3 %v2882_v7  ;;  %643 = vmatpush.msra.mxu0 %v2689_v16 }
  0x54   :  { %565 = vmatpush.msrb.mxu2 %v2895_v18  ;;  %670 = vmatpush.msra.mxu1 %v2874_v5 }
  0x55   :  { %456 = vmatpush.msra.mxu3 %v2888_v12  ;;  %644 = vmatpush.msra.mxu0 %v2693_v17 }
  0x56   :  { %1864 = vmatmul.msk.f32.gmra.mxu2 %vm174_vm1, %v157_v63  ;;  %671 = vmatpush.msra.mxu1 %v2882_v7 }
  0x57   :  { %457 = vmatpush.msra.mxu3 %v2895_v18  ;;  %566 = vmatpush.msrb.mxu2 %v2902_v21 }
  0x58   :  { %645 = vmatpush.msra.mxu0 %v2709_v19  ;;  %672 = vmatpush.msra.mxu1 %v2888_v12 }
  0x59   :  { %458 = vmatpush.msra.mxu3 %v2902_v21  ;;  %567 = vmatpush.msrb.mxu2 %v2908_v26 }
  0x5a   :  { %646 = vmatpush.msra.mxu0 %v2713_v20  ;;  %673 = vmatpush.msra.mxu1 %v2895_v18 }
  0x5b   :  { %459 = vmatpush.msra.mxu3 %v2908_v26  ;;  %680 = vmatpush.msra.mxu2 %v2746_v28 }
  0x5c   :  { %647 = vmatpush.msra.mxu0 %v2720_v22  ;;  %674 = vmatpush.msra.mxu1 %v2902_v21 }
  0x5d   :  { %681 = vmatpush.msra.mxu2 %v2752_v30 }
  0x5e   :  { %648 = vmatpush.msra.mxu0 %v2724_v23  ;;  %675 = vmatpush.msra.mxu1 %v2908_v26 }
  0x5f   :  { %682 = vmatpush.msra.mxu2 %v2760_v32 }
  0x60   :  { %649 = vmatpush.msra.mxu0 %v2730_v24 }
  0x61   :  { %683 = vmatpush.msra.mxu2 %v2767_v34 }
  0x62   :  { %650 = vmatpush.msra.mxu0 %v2734_v25 }
  0x63   :  { %684 = vmatpush.msra.mxu2 %v2781_v38 }
  0x64   :  { %651 = vmatpush.msra.mxu0 %v2741_v27 }
  0x65   :  { %685 = vmatpush.msra.mxu2 %v2788_v40 }
  0x66   :  { %652 = vmatpush.msra.mxu0 %v2750_v29 }
  0x67   :  { %686 = vmatpush.msra.mxu2 %v2798_v43 }
  0x68   :  { %653 = vmatpush.msra.mxu0 %v2758_v31 }
  0x69   :  { %687 = vmatpush.msra.mxu2 %v2804_v45 }
  0x6a   :  { %654 = vmatpush.msra.mxu0 %v2765_v33 }
  0x6b   :  { %688 = vmatpush.msra.mxu2 %v2811_v47 }
  0x6c   :  { %655 = vmatpush.msra.mxu0 %v2775_v36 }
  0x6d   :  { %689 = vmatpush.msra.mxu2 %v2831_v52 }
  0x6f   :  { %690 = vmatpush.msra.mxu2 %v2841_v58 }
  0x71   :  { %691 = vmatpush.msra.mxu2 %v2849_v62 }
  0x73   :  { %692 = vmatpush.msra.mxu2 %v2858_v1 }
  0x75   :  { %693 = vmatpush.msra.mxu2 %v2863_v2 }
  0x77   :  { %694 = vmatpush.msra.mxu2 %v2870_v4 }
  0x79   :  { %695 = vmatpush.msra.mxu2 %v2878_v6 }
  0x97   :  { %v226_v53 = vpop.f32.mrf.mxu0  ;;  %v267_v54 = vpop.f32.mrf.mxu1 }
  0x98   :  { %v227_v55 = vadd.f32 %v226_v53, %v2819_v49  ;;  %v268_v56 = vadd.f32 %v267_v54, %v2822_v50 }
  0x9a   :  { %v1865_v59 = vmul.f32 -1.442695, %v227_v55  ;;  %v1866_v60 = vmul.f32 -1.442695, %v268_v56 }
  0x9c   :  { %2231 = vpow2.f32 %v1865_v59 }
  0x9d   :  { %2233 = vpow2.f32 %v1866_v60  ;;  %v2925_v60 = vperm.slane %v2793_v41, 2 }
  0xa1   :  { %v308_v50 = vpop.f32.mrf.mxu2 }
  0xa2   :  { %v2232_v8 = vpop.eup %2231 }
  0xa3   :  { %v2234_v9 = vpop.eup %2233  ;;  %v383_v10 = vadd.f32 1.0, %v2232_v8 }
  0xa4   :  { %v2891_v15 = vadd.f32 1.0, %v2234_v9 }
  0xa5   :  { %2235 = vrcp.f32 %v383_v10  ;;  %v395_v59 = vand.u32 2147483648, %v383_v10  ;;  %v393_v8 = vand.u32 2147483647, %v383_v10  ;;  %vm389_vm3 = vweird.f32 %v383_v10 }
  0xa6   :  { %2237 = vrcp.f32 %v2891_v15  ;;  %vm408_vm6 = vweird.f32 %v2891_v15 }
  0xa7   :  { %v396_v41 = vor.u32 1.1754944e-38, %v395_v59  ;;  %vm394_vm5 = vcmp.eq.f32.partialorder %v393_v8, 8.507059e+37  ;;  %v414_v59 = vand.u32 2147483648, %v2891_v15 }
  0xab   :  { %v2236_v35 = vpop.eup %2235 }
  0xac   :  { %v2238_v46 = vpop.eup %2237  ;;  %v385_v53 = vmul.f32 %v2236_v35, %v383_v10  ;;  %vm390_vm2 = vweird.f32 %v2236_v35 }
  0xad   :  { %v404_v54 = vmul.f32 %v2238_v46, %v2891_v15  ;;  %vm391_vm4 = vmor %vm389_vm3, %vm390_vm2  ;;  %vm409_vm7 = vweird.f32 %v2238_v46 }
  0xae   :  { %v386_v55 = vsub.f32 1.0, %v385_v53  ;;  %vm410_vm8 = vmor %vm408_vm6, %vm409_vm7 }
  0xaf   :  { %v405_v56 = vsub.f32 1.0, %v404_v54  ;;  %v2930_v54 = vld [vmem:[#allocation12 + $0x5] ss:$0 sm:$0xff] }
  0xb0   :  { %v387_v63 = vmul.f32 %v2236_v35, %v386_v55  ;;  %3366 = vst [vmem:[#allocation46_spill] sm:$0xff] %v2930_v54  ;;  %v309_v55 = vadd.f32 %v308_v50, %v2925_v60  ;;  %v412_v50 = vand.u32 2147483647, %v2891_v15 }
  0xb1   :  { %v406_v9 = vmul.f32 %v2238_v46, %v405_v56 }
  0xb2   :  { %v388_v53 = vadd.f32 %v2236_v35, %v387_v63  ;;  %vm413_vm9 = vcmp.eq.f32.partialorder %v412_v50, 8.507059e+37 }
  0xb3   :  { %v407_v20 = vadd.f32 %v2238_v46, %v406_v9  ;;  %v3367_v9 = vld [vmem:[#allocation33_spill] sm:$0xff] }
  0xb4   :  { %v392_v56 = vsel %vm391_vm4, %v2236_v35, %v388_v53  ;;  %v229_v53 = vpop.f32.mrf.mxu0 }
  0xb5   :  { %v397_v49 = vsel %vm394_vm5, %v396_v41, %v392_v56  ;;  %v411_v63 = vsel %vm410_vm8, %v2238_v46, %v407_v20  ;;  %v3020_v41 = vpop.f32.mrf.mxu3 }
  0xb6   :  { %v419_v10 = vmul.f32 %v2930_v54, %v397_v49  ;;  %v415_v49 = vor.u32 1.1754944e-38, %v414_v59  ;;  %3368 = vst [vmem:[#allocation33_spill] sm:$0xff] %v3020_v41 }
  0xb8   :  { %v420_v35 = vadd.f32 %v419_v10, %v309_v55  ;;  %v416_v15 = vsel %vm413_vm9, %v415_v49, %v411_v63  ;;  %v3376_v49 = vld [vmem:[#allocation37_spill] sm:$0xff] }
  0xb9   :  { %v422_v20 = vsub.f32 1.0, %v416_v15  ;;  %v230_v15 = vadd.f32 %v229_v53, %v3376_v49 }
  0xba   :  { %2239 = vtanh.f32 %v420_v35 }
  0xbc   :  { %v3022_v55 = vpop.f32.mrf.mxu0 }
  0xbd   :  { %3369 = vst [vmem:[#allocation47_spill] sm:$0xff] %v3022_v55  ;;  %v3024_v56 = vpop.f32.mrf.mxu3 }
  0xbe   :  { %3370 = vst [vmem:[#allocation48_spill] sm:$0xff] %v3024_v56  ;;  %v3378_v56 = vld [vmem:[#allocation38_spill] sm:$0xff] }
  0xc0   :  { %v2240_v46 = vpop.eup %2239 }
  0xc1   :  { %v2957_v8 = vmul.f32 %v2240_v46, %v422_v20 }
  0xc3   :  { %440 = vmatmul.f32.vlgmr.msrb.gmra.mxu3 %v2957_v8  ;;  %480 = vmatmul.f32.vlgmr.msrb.gmra.mxu0 %v2957_v8 }
  0xc4   :  { %572 = vmatpush.msrb.mxu3 %v2746_v28  ;;  %768 = vmatpush.msrb.mxu0 %v2779_v37  ;;  %v3026_v10 = vpop.f32.mrf.mxu0 }
  0xc5   :  { %3371 = vst [vmem:[#allocation49_spill] sm:$0xff] %v3026_v10  ;;  %v3028_v59 = vpop.f32.mrf.mxu3 }
  0xc6   :  { %573 = vmatpush.msrb.mxu3 %v2752_v30  ;;  %769 = vmatpush.msrb.mxu0 %v2786_v39  ;;  %3372 = vst [vmem:[#allocation50_spill] sm:$0xff] %v3028_v59 }
  0xc8   :  { %574 = vmatpush.msrb.mxu3 %v2760_v32  ;;  %770 = vmatpush.msrb.mxu0 %v2796_v42 }
  0xca   :  { %575 = vmatpush.msrb.mxu3 %v2767_v34  ;;  %771 = vmatpush.msrb.mxu0 %v2802_v44 }
  0xcb   :  { %460 = vmatmul.f32.vlgmr.msra.gmra.mxu3 %v2957_v8 }
  0xcc   :  { %576 = vmatpush.msrb.mxu3 %v2781_v38  ;;  %772 = vmatpush.msrb.mxu0 %v2815_v48  ;;  %v3030_v50 = vpop.f32.mrf.mxu0 }
  0xcd   :  { %3373 = vst [vmem:[#allocation51_spill] sm:$0xff] %v3030_v50  ;;  %v3032_v35 = vpop.f32.mrf.mxu3 }
  0xce   :  { %577 = vmatpush.msrb.mxu3 %v2788_v40  ;;  %773 = vmatpush.msrb.mxu0 %v2829_v51  ;;  %3374 = vst [vmem:[#allocation52_spill] sm:$0xff] %v3032_v35 }
  0xd0   :  { %578 = vmatpush.msrb.mxu3 %v2798_v43  ;;  %774 = vmatpush.msrb.mxu0 %v2839_v57 }
  0xd2   :  { %579 = vmatpush.msrb.mxu3 %v2804_v45  ;;  %775 = vmatpush.msrb.mxu0 %v2847_v61 }
  0xd4   :  { %580 = vmatpush.msrb.mxu3 %v2811_v47  ;;  %776 = vmatpush.msrb.mxu0 %v2856_v0  ;;  %v3034_v63 = vpop.f32.mrf.mxu0 }
  0xd5   :  { %3375 = vst [vmem:[#allocation53_spill] sm:$0xff] %v3034_v63 }
  0xd6   :  { %581 = vmatpush.msrb.mxu3 %v2831_v52  ;;  %777 = vmatpush.msrb.mxu0 %v2867_v3 }
  0xd8   :  { %582 = vmatpush.msrb.mxu3 %v2841_v58  ;;  %778 = vmatpush.msrb.mxu0 %v2874_v5 }
  0xda   :  { %583 = vmatpush.msrb.mxu3 %v2849_v62  ;;  %779 = vmatpush.msrb.mxu0 %v2882_v7 }
  0xdc   :  { %584 = vmatpush.msrb.mxu3 %v2858_v1  ;;  %780 = vmatpush.msrb.mxu0 %v2888_v12 }
  0xde   :  { %585 = vmatpush.msrb.mxu3 %v2863_v2  ;;  %781 = vmatpush.msrb.mxu0 %v2895_v18 }
  0xe0   :  { %586 = vmatpush.msrb.mxu3 %v2870_v4  ;;  %782 = vmatpush.msrb.mxu0 %v2902_v21 }
  0xe2   :  { %587 = vmatpush.msrb.mxu3 %v2878_v6  ;;  %783 = vmatpush.msrb.mxu0 %v2908_v26  ;;  %v270_v26 = vpop.f32.mrf.mxu1 }
  0xe3   :  { %v271_v55 = vadd.f32 %v270_v26, %v3378_v56  ;;  %v311_v56 = vpop.f32.mrf.mxu2 }
  0xe4   :  { %748 = vmatpush.msra.mxu3 %v2671_v11 }
  0xe6   :  { %749 = vmatpush.msra.mxu3 %v2678_v13 }
  0xe8   :  { %750 = vmatpush.msra.mxu3 %v2682_v14 }
  0xea   :  { %751 = vmatpush.msra.mxu3 %v2689_v16 }
  0xec   :  { %752 = vmatpush.msra.mxu3 %v2693_v17 }
  0xee   :  { %753 = vmatpush.msra.mxu3 %v2709_v19 }
  0xf0   :  { %754 = vmatpush.msra.mxu3 %v3367_v9 }
  0xf2   :  { %755 = vmatpush.msra.mxu3 %v2720_v22 }
  0xf4   :  { %756 = vmatpush.msra.mxu3 %v2724_v23 }
  0xf6   :  { %757 = vmatpush.msra.mxu3 %v2730_v24 }
  0xf8   :  { %758 = vmatpush.msra.mxu3 %v2734_v25 }
  0xfa   :  { %759 = vmatpush.msra.mxu3 %v2741_v27 }
  0xfc   :  { %760 = vmatpush.msra.mxu3 %v2750_v29 }
  0xfe   :  { %761 = vmatpush.msra.mxu3 %v2758_v31 }
 0x100   :  { %762 = vmatpush.msra.mxu3 %v2765_v33 }
 0x102   :  { %763 = vmatpush.msra.mxu3 %v2775_v36  ;;  %v3037_v36 = vpop.f32.mrf.mxu0 }
 0x103   :  { %3377 = vst [vmem:[#allocation54_spill] sm:$0xff] %v3037_v36 }
 0x10a   :  { %v3040_v35 = vpop.f32.mrf.mxu0 }
 0x10b   :  { %3379 = vst [vmem:[#allocation55_spill] sm:$0xff] %v3040_v35  ;;  %v312_v35 = vadd.f32 %v311_v56, %v2925_v60 }
 0x140   :  { %v481_v36 = vpop.f32.mrf.mxu0 }
 0x146   :  { %v441_v20 = vpop.f32.mrf.mxu3 }
 0x147   :  { %v484_v46 = vadd.f32 %v441_v20, %v230_v15 }
 0x149   :  { %v1867_v41 = vmul.f32 -1.442695, %v484_v46 }
 0x14b   :  { %2241 = vpow2.f32 %v1867_v41 }
 0x14e   :  { %v461_v10 = vpop.f32.mrf.mxu3 }
 0x14f   :  { %v504_v6 = vadd.f32 %v461_v10, %v271_v55 }
 0x151   :  { %v2242_v59 = vpop.eup %2241  ;;  %v1868_v21 = vmul.f32 -1.442695, %v504_v6 }
 0x152   :  { %v488_v50 = vadd.f32 1.0, %v2242_v59 }
 0x153   :  { %2243 = vpow2.f32 %v1868_v21  ;;  %v524_v21 = vadd.f32 %v2930_v54, %v481_v36 }
 0x154   :  { %2245 = vrcp.f32 %v488_v50  ;;  %v500_v46 = vand.u32 2147483648, %v488_v50  ;;  %v498_v26 = vand.u32 2147483647, %v488_v50  ;;  %vm494_vm11 = vweird.f32 %v488_v50 }
 0x156   :  { %v501_v10 = vor.u32 1.1754944e-38, %v500_v46  ;;  %vm499_vm13 = vcmp.eq.f32.partialorder %v498_v26, 8.507059e+37 }
 0x159   :  { %v2244_v63 = vpop.eup %2243 }
 0x15a   :  { %v2246_v53 = vpop.eup %2245  ;;  %v508_v49 = vadd.f32 1.0, %v2244_v63 }
 0x15b   :  { %v490_v15 = vmul.f32 %v2246_v53, %v488_v50  ;;  %vm495_vm10 = vweird.f32 %v2246_v53 }
 0x15c   :  { %2247 = vrcp.f32 %v508_v49  ;;  %vm496_vm12 = vmor %vm494_vm11, %vm495_vm10  ;;  %v520_v18 = vand.u32 2147483648, %v508_v49  ;;  %v518_v2 = vand.u32 2147483647, %v508_v49  ;;  %vm514_vm15 = vweird.f32 %v508_v49 }
 0x15d   :  { %v491_v20 = vsub.f32 1.0, %v490_v15 }
 0x15e   :  { %v521_v36 = vor.u32 1.1754944e-38, %v520_v18  ;;  %vm519_vm1 = vcmp.eq.f32.partialorder %v518_v2, 8.507059e+37  ;;  %v3382_v2 = vld [vmem:[#allocation43_spill] sm:$0xff] }
 0x15f   :  { %v492_v41 = vmul.f32 %v2246_v53, %v491_v20  ;;  %v3384_v18 = vld [vmem:[#allocation35_spill] sm:$0xff] }
 0x161   :  { %v493_v55 = vadd.f32 %v2246_v53, %v492_v41 }
 0x162   :  { %v2248_v6 = vpop.eup %2247 }
 0x163   :  { %v510_v59 = vmul.f32 %v2248_v6, %v508_v49  ;;  %v497_v63 = vsel %vm496_vm12, %v2246_v53, %v493_v55  ;;  %vm515_vm14 = vweird.f32 %v2248_v6  ;;  %v3388_v49 = vld [vmem:[#allocation45_spill] sm:$0xff] }
 0x164   :  { %v502_v33 = vsel %vm499_vm13, %v501_v10, %v497_v63  ;;  %vm516_vm0 = vmor %vm514_vm15, %vm515_vm14  ;;  %v273_v63 = vpop.f32.mrf.mxu1 }
 0x165   :  { %v511_v15 = vsub.f32 1.0, %v510_v59  ;;  %v525_v4 = vmul.f32 %v524_v21, %v502_v33  ;;  %v3381_v33 = vld [vmem:[#allocation34_spill] sm:$0xff] }
 0x167   :  { %v512_v20 = vmul.f32 %v2248_v6, %v511_v15  ;;  %v526_v31 = vadd.f32 %v525_v4, %v312_v35  ;;  %v3383_v4 = vld [vmem:[#allocation40_spill] sm:$0xff] }
 0x168   :  { %v3387_v35 = vld [vmem:[#allocation36_spill] sm:$0xff] }
 0x169   :  { %2249 = vtanh.f32 %v526_v31  ;;  %v513_v50 = vadd.f32 %v2248_v6, %v512_v20  ;;  %v3380_v31 = vld [vmem:[#allocation39_spill] sm:$0xff] }
 0x16b   :  { %v517_v41 = vsel %vm516_vm0, %v2248_v6, %v513_v50  ;;  %v314_v6 = vpop.f32.mrf.mxu2 }
 0x16c   :  { %v522_v46 = vsel %vm519_vm1, %v521_v36, %v517_v41  ;;  %v3106_v20 = vpop.f32.mrf.mxu1  ;;  %v3395_v36 = vld [vmem:[#allocation37_spill] sm:$0xff]  ;;  %v3396_v41 = vld [vmem:[#allocation47_spill] sm:$0xff] }
 0x16d   :  { %v528_v54 = vsub.f32 1.0, %v522_v46  ;;  %v530_v26 = vmul.f32 %v522_v46, %v2957_v8  ;;  %v3386_v8 = vld [vmem:[#allocation41_spill] sm:$0xff]  ;;  %3393 = vst [vmem:[#allocation60_spill] sm:$0xff] %v3106_v20  ;;  %v233_v46 = vadd.f32 %v3396_v41, %v3395_v36 }
 0x16f   :  { %v2250_v56 = vpop.eup %2249 }
 0x170   :  { %v529_v53 = vmul.f32 %v2250_v56, %v528_v54  ;;  %v3385_v54 = vld [vmem:[#allocation44_spill] sm:$0xff] }
 0x172   :  { %v3045_v55 = vadd.f32 %v530_v26, %v529_v53 }
 0x173   :  { %v3098_v21 = vpop.f32.mrf.mxu2 }
 0x174   :  { %548 = vmatmul.f32.vlgmr.msrb.gmra.mxu1 %v3045_v55  ;;  %568 = vmatmul.f32.vlgmr.msrb.gmra.mxu2 %v3045_v55  ;;  %3389 = vst [vmem:[#allocation56_spill] sm:$0xff] %v3098_v21 }
 0x175   :  { %588 = vmatmul.f32.vlgmr.msrb.gmra.mxu3 %v3045_v55  ;;  %788 = vmatpush.msrb.mxu1 %v2746_v28 }
 0x176   :  { %856 = vmatpush.msrb.mxu2 %v2671_v11  ;;  %876 = vmatpush.msrb.mxu3 %v2779_v37 }
 0x177   :  { %789 = vmatpush.msrb.mxu1 %v2752_v30 }
 0x178   :  { %857 = vmatpush.msrb.mxu2 %v2678_v13  ;;  %877 = vmatpush.msrb.mxu3 %v2786_v39 }
 0x179   :  { %790 = vmatpush.msrb.mxu1 %v2760_v32 }
 0x17a   :  { %858 = vmatpush.msrb.mxu2 %v2682_v14  ;;  %878 = vmatpush.msrb.mxu3 %v2796_v42 }
 0x17b   :  { %791 = vmatpush.msrb.mxu1 %v2767_v34  ;;  %v3100_v10 = vpop.f32.mrf.mxu2 }
 0x17c   :  { %859 = vmatpush.msrb.mxu2 %v2689_v16  ;;  %879 = vmatpush.msrb.mxu3 %v2802_v44  ;;  %3390 = vst [vmem:[#allocation57_spill] sm:$0xff] %v3100_v10 }
 0x17d   :  { %792 = vmatpush.msrb.mxu1 %v2781_v38 }
 0x17e   :  { %860 = vmatpush.msrb.mxu2 %v2693_v17  ;;  %880 = vmatpush.msrb.mxu3 %v2815_v48 }
 0x17f   :  { %793 = vmatpush.msrb.mxu1 %v2788_v40 }
 0x180   :  { %861 = vmatpush.msrb.mxu2 %v2709_v19  ;;  %881 = vmatpush.msrb.mxu3 %v2829_v51 }
 0x181   :  { %794 = vmatpush.msrb.mxu1 %v2798_v43 }
 0x182   :  { %862 = vmatpush.msrb.mxu2 %v3367_v9  ;;  %882 = vmatpush.msrb.mxu3 %v2839_v57 }
 0x183   :  { %795 = vmatpush.msrb.mxu1 %v2804_v45  ;;  %v3102_v59 = vpop.f32.mrf.mxu2 }
 0x184   :  { %863 = vmatpush.msrb.mxu2 %v2720_v22  ;;  %883 = vmatpush.msrb.mxu3 %v2847_v61  ;;  %3391 = vst [vmem:[#allocation58_spill] sm:$0xff] %v3102_v59 }
 0x185   :  { %796 = vmatpush.msrb.mxu1 %v2811_v47 }
 0x186   :  { %864 = vmatpush.msrb.mxu2 %v2724_v23  ;;  %884 = vmatpush.msrb.mxu3 %v2856_v0 }
 0x187   :  { %797 = vmatpush.msrb.mxu1 %v2831_v52 }
 0x188   :  { %865 = vmatpush.msrb.mxu2 %v2730_v24  ;;  %885 = vmatpush.msrb.mxu3 %v2867_v3 }
 0x189   :  { %798 = vmatpush.msrb.mxu1 %v2841_v58 }
 0x18a   :  { %866 = vmatpush.msrb.mxu2 %v2734_v25  ;;  %886 = vmatpush.msrb.mxu3 %v2874_v5 }
 0x18b   :  { %799 = vmatpush.msrb.mxu1 %v2849_v62  ;;  %v3104_v15 = vpop.f32.mrf.mxu2 }
 0x18c   :  { %867 = vmatpush.msrb.mxu2 %v2741_v27  ;;  %887 = vmatpush.msrb.mxu3 %v2882_v7  ;;  %3392 = vst [vmem:[#allocation59_spill] sm:$0xff] %v3104_v15 }
 0x18d   :  { %800 = vmatpush.msrb.mxu1 %v2858_v1 }
 0x18e   :  { %868 = vmatpush.msrb.mxu2 %v2750_v29  ;;  %888 = vmatpush.msrb.mxu3 %v2888_v12 }
 0x18f   :  { %801 = vmatpush.msrb.mxu1 %v3380_v31 }
 0x190   :  { %869 = vmatpush.msrb.mxu2 %v3381_v33  ;;  %889 = vmatpush.msrb.mxu3 %v3382_v2 }
 0x191   :  { %802 = vmatpush.msrb.mxu1 %v3383_v4 }
 0x192   :  { %870 = vmatpush.msrb.mxu2 %v3384_v18  ;;  %890 = vmatpush.msrb.mxu3 %v3385_v54 }
 0x193   :  { %803 = vmatpush.msrb.mxu1 %v3386_v8  ;;  %v3108_v50 = vpop.f32.mrf.mxu2 }
 0x194   :  { %871 = vmatpush.msrb.mxu2 %v3387_v35  ;;  %891 = vmatpush.msrb.mxu3 %v3388_v49  ;;  %3394 = vst [vmem:[#allocation61_spill] sm:$0xff] %v3108_v50  ;;  %v3397_v49 = vld [vmem:[#allocation38_spill] sm:$0xff] }
 0x195   :  { %v274_v35 = vadd.f32 %v273_v63, %v3397_v49 }
 0x1f1   :  { %v549_v56 = vpop.f32.mrf.mxu1 }
 0x1f2   :  { %v592_v53 = vadd.f32 %v549_v56, %v233_v46 }
 0x1f4   :  { %v1869_v26 = vmul.f32 -1.442695, %v592_v53 }
 0x1f6   :  { %2251 = vpow2.f32 %v1869_v26 }
 0x1f7   :  { %v569_v21 = vpop.f32.mrf.mxu2 }
 0x1f8   :  { %v612_v10 = vadd.f32 %v569_v21, %v274_v35  ;;  %v589_v63 = vpop.f32.mrf.mxu3 }
 0x1fa   :  { %v1870_v8 = vmul.f32 -1.442695, %v612_v10  ;;  %v3398_v10 = vld [vmem:[#allocation46_spill] sm:$0xff] }
 0x1fc   :  { %v2252_v59 = vpop.eup %2251  ;;  %2253 = vpow2.f32 %v1870_v8 }
 0x1fd   :  { %v596_v54 = vadd.f32 1.0, %v2252_v59  ;;  %v632_v59 = vadd.f32 %v3398_v10, %v589_v63 }
 0x1ff   :  { %2255 = vrcp.f32 %v596_v54  ;;  %v608_v41 = vand.u32 2147483648, %v596_v54  ;;  %v606_v46 = vand.u32 2147483647, %v596_v54  ;;  %vm602_vm3 = vweird.f32 %v596_v54 }
 0x201   :  { %v609_v35 = vor.u32 1.1754944e-38, %v608_v41  ;;  %vm607_vm5 = vcmp.eq.f32.partialorder %v606_v46, 8.507059e+37 }
 0x202   :  { %v2254_v15 = vpop.eup %2253 }
 0x203   :  { %v616_v20 = vadd.f32 1.0, %v2254_v15  ;;  %v315_v15 = vadd.f32 %v314_v6, %v2925_v60 }
 0x205   :  { %v2256_v18 = vpop.eup %2255  ;;  %2257 = vrcp.f32 %v616_v20  ;;  %v626_v33 = vand.u32 2147483647, %v616_v20  ;;  %vm622_vm7 = vweird.f32 %v616_v20 }
 0x206   :  { %v598_v50 = vmul.f32 %v2256_v18, %v596_v54  ;;  %vm603_vm2 = vweird.f32 %v2256_v18 }
 0x207   :  { %vm604_vm4 = vmor %vm602_vm3, %vm603_vm2  ;;  %vm627_vm9 = vcmp.eq.f32.partialorder %v626_v33, 8.507059e+37 }
 0x208   :  { %v599_v4 = vsub.f32 1.0, %v598_v50 }
 0x20a   :  { %v600_v36 = vmul.f32 %v2256_v18, %v599_v4  ;;  %v628_v4 = vand.u32 2147483648, %v616_v20 }
 0x20b   :  { %v2258_v56 = vpop.eup %2257 }
 0x20c   :  { %v618_v53 = vmul.f32 %v2258_v56, %v616_v20  ;;  %v601_v26 = vadd.f32 %v2256_v18, %v600_v36  ;;  %vm623_vm6 = vweird.f32 %v2258_v56  ;;  %v629_v36 = vor.u32 1.1754944e-38, %v628_v4 }
 0x20d   :  { %vm624_vm8 = vmor %vm622_vm7, %vm623_vm6 }
 0x20e   :  { %v619_v8 = vsub.f32 1.0, %v618_v53  ;;  %v605_v21 = vsel %vm604_vm4, %v2256_v18, %v601_v26 }
 0x20f   :  { %v610_v49 = vsel %vm607_vm5, %v609_v35, %v605_v21 }
 0x210   :  { %v620_v50 = vmul.f32 %v2258_v56, %v619_v8  ;;  %v633_v2 = vmul.f32 %v632_v59, %v610_v49 }
 0x212   :  { %v634_v31 = vadd.f32 %v633_v2, %v315_v15  ;;  %v621_v12 = vadd.f32 %v2258_v56, %v620_v50  ;;  %v3413_v15 = vld [vmem:[#allocation56_spill] sm:$0xff] }
 0x213   :  { %v318_v50 = vadd.f32 %v3413_v15, %v2925_v60 }
 0x214   :  { %2259 = vtanh.f32 %v634_v31  ;;  %v625_v54 = vsel %vm624_vm8, %v2258_v56, %v621_v12 }
 0x215   :  { %v630_v18 = vsel %vm627_vm9, %v629_v36, %v625_v54 }
 0x216   :  { %v636_v41 = vsub.f32 1.0, %v630_v18  ;;  %v638_v6 = vmul.f32 %v630_v18, %v3045_v55 }
 0x21a   :  { %v2260_v46 = vpop.eup %2259 }
 0x21b   :  { %v637_v63 = vmul.f32 %v2260_v46, %v636_v41 }
 0x21d   :  { %v3116_v53 = vadd.f32 %v638_v6, %v637_v63 }
 0x21f   :  { %656 = vmatmul.f32.vlgmr.msra.gmra.mxu0 %v3116_v53  ;;  %676 = vmatmul.f32.vlgmr.msra.gmra.mxu1 %v3116_v53 }
 0x220   :  { %696 = vmatmul.f32.vlgmr.msra.gmra.mxu2 %v3116_v53  ;;  %896 = vmatpush.msra.mxu0 %v2746_v28  ;;  %v3410_v28 = vld [vmem:[#allocation49_spill] sm:$0xff] }
 0x221   :  { %964 = vmatpush.msra.mxu1 %v2671_v11  ;;  %984 = vmatpush.msra.mxu2 %v2779_v37  ;;  %v3399_v11 = vld [vmem:[#allocation42_spill] sm:$0xff] }
 0x222   :  { %897 = vmatpush.msra.mxu0 %v2752_v30  ;;  %v3411_v30 = vld [vmem:[#allocation38_spill] sm:$0xff] }
 0x223   :  { %965 = vmatpush.msra.mxu1 %v2678_v13  ;;  %985 = vmatpush.msra.mxu2 %v2786_v39  ;;  %v3400_v13 = vld [vmem:[#allocation39_spill] sm:$0xff] }
 0x224   :  { %898 = vmatpush.msra.mxu0 %v2760_v32  ;;  %v3412_v32 = vld [vmem:[#allocation60_spill] sm:$0xff] }
 0x225   :  { %966 = vmatpush.msra.mxu1 %v2682_v14  ;;  %986 = vmatpush.msra.mxu2 %v2796_v42  ;;  %v3401_v14 = vld [vmem:[#allocation34_spill] sm:$0xff] }
 0x226   :  { %899 = vmatpush.msra.mxu0 %v2767_v34  ;;  %v277_v34 = vadd.f32 %v3412_v32, %v3411_v30  ;;  %v2312_v32 = vld [vmem:[#allocation10 + $0x168] sm:$0xff] }
 0x227   :  { %967 = vmatpush.msra.mxu1 %v2689_v16  ;;  %987 = vmatpush.msra.mxu2 %v2802_v44  ;;  %v3402_v16 = vld [vmem:[#allocation43_spill] sm:$0xff] }
 0x228   :  { %900 = vmatpush.msra.mxu0 %v2781_v38 }
 0x229   :  { %968 = vmatpush.msra.mxu1 %v2693_v17  ;;  %988 = vmatpush.msra.mxu2 %v2815_v48  ;;  %v3403_v17 = vld [vmem:[#allocation40_spill] sm:$0xff] }
 0x22a   :  { %901 = vmatpush.msra.mxu0 %v2788_v40 }
 0x22b   :  { %969 = vmatpush.msra.mxu1 %v2709_v19  ;;  %989 = vmatpush.msra.mxu2 %v2829_v51  ;;  %v3404_v19 = vld [vmem:[#allocation35_spill] sm:$0xff] }
 0x22c   :  { %902 = vmatpush.msra.mxu0 %v2798_v43 }
 0x22d   :  { %970 = vmatpush.msra.mxu1 %v3367_v9  ;;  %990 = vmatpush.msra.mxu2 %v2839_v57 }
 0x22e   :  { %903 = vmatpush.msra.mxu0 %v2804_v45 }
 0x22f   :  { %971 = vmatpush.msra.mxu1 %v2720_v22  ;;  %991 = vmatpush.msra.mxu2 %v2847_v61  ;;  %v3405_v22 = vld [vmem:[#allocation44_spill] sm:$0xff] }
 0x230   :  { %904 = vmatpush.msra.mxu0 %v2811_v47 }
 0x231   :  { %972 = vmatpush.msra.mxu1 %v2724_v23  ;;  %992 = vmatpush.msra.mxu2 %v2856_v0  ;;  %v3406_v23 = vld [vmem:[#allocation41_spill] sm:$0xff] }
 0x232   :  { %905 = vmatpush.msra.mxu0 %v2831_v52 }
 0x233   :  { %973 = vmatpush.msra.mxu1 %v2730_v24  ;;  %993 = vmatpush.msra.mxu2 %v2867_v3  ;;  %v3407_v24 = vld [vmem:[#allocation36_spill] sm:$0xff] }
 0x234   :  { %906 = vmatpush.msra.mxu0 %v2841_v58 }
 0x235   :  { %974 = vmatpush.msra.mxu1 %v2734_v25  ;;  %994 = vmatpush.msra.mxu2 %v2874_v5  ;;  %v3408_v25 = vld [vmem:[#allocation45_spill] sm:$0xff] }
 0x236   :  { %907 = vmatpush.msra.mxu0 %v2849_v62 }
 0x237   :  { %975 = vmatpush.msra.mxu1 %v2741_v27  ;;  %995 = vmatpush.msra.mxu2 %v2882_v7  ;;  %v3409_v27 = vld [vmem:[#allocation37_spill] sm:$0xff] }
 0x238   :  { %908 = vmatpush.msra.mxu0 %v2858_v1 }
 0x239   :  { %976 = vmatpush.msra.mxu1 %v2750_v29  ;;  %996 = vmatpush.msra.mxu2 %v3399_v11  ;;  %v236_v29 = vadd.f32 %v3410_v28, %v3409_v27 }
 0x23a   :  { %909 = vmatpush.msra.mxu0 %v3400_v13 }
 0x23b   :  { %977 = vmatpush.msra.mxu1 %v3401_v14  ;;  %997 = vmatpush.msra.mxu2 %v3402_v16 }
 0x23c   :  { %910 = vmatpush.msra.mxu0 %v3403_v17 }
 0x23d   :  { %978 = vmatpush.msra.mxu1 %v3404_v19  ;;  %998 = vmatpush.msra.mxu2 %v3405_v22 }
 0x23e   :  { %911 = vmatpush.msra.mxu0 %v3406_v23 }
 0x23f   :  { %979 = vmatpush.msra.mxu1 %v3407_v24  ;;  %999 = vmatpush.msra.mxu2 %v3408_v25 }
 0x29c   :  { %v657_v37 = vpop.f32.mrf.mxu0  ;;  %v677_v38 = vpop.f32.mrf.mxu1 }
 0x29d   :  { %v700_v39 = vadd.f32 %v657_v37, %v236_v29  ;;  %v720_v40 = vadd.f32 %v677_v38, %v277_v34  ;;  %v3182_v29 = vld [vmem:[#allocation10 + $0x178] sm:$0xff]  ;;  %v2313_v34 = vld [vmem:[#allocation10 + $0x170] sm:$0xff]  ;;  %v3185_v37 = vld [vmem:[#allocation10 + $0x160] sm:$0xff] }
 0x29e   :  { %v2316_v38 = vld [vmem:[#allocation10 + $0x158] sm:$0xff] }
 0x29f   :  { %v1871_v42 = vmul.f32 -1.442695, %v700_v39  ;;  %v1872_v43 = vmul.f32 -1.442695, %v720_v40  ;;  %v3188_v39 = vld [vmem:[#allocation10 + $0x148] sm:$0xff]  ;;  %v2318_v40 = vld [vmem:[#allocation10 + $0x138] sm:$0xff] }
 0x2a1   :  { %2261 = vpow2.f32 %v1871_v42  ;;  %v2319_v42 = vld [vmem:[#allocation10 + $0x140] sm:$0xff] }
 0x2a2   :  { %2263 = vpow2.f32 %v1872_v43  ;;  %v3191_v43 = vld [vmem:[#allocation10 + $0x130] sm:$0xff] }
 0x2a3   :  { %v697_v20 = vpop.f32.mrf.mxu2 }
 0x2a4   :  { %v740_v8 = vadd.f32 %v3398_v10, %v697_v20  ;;  %v3212_v20 = vld [vmem:[#allocation10 + $0xa0] sm:$0xff] }
 0x2a7   :  { %v2262_v44 = vpop.eup %2261 }
 0x2a8   :  { %v2264_v45 = vpop.eup %2263  ;;  %v704_v47 = vadd.f32 1.0, %v2262_v44  ;;  %v2321_v44 = vld [vmem:[#allocation10 + $0x120] sm:$0xff] }
 0x2a9   :  { %v724_v48 = vadd.f32 1.0, %v2264_v45  ;;  %v2322_v45 = vld [vmem:[#allocation10 + $0x128] sm:$0xff] }
 0x2aa   :  { %2265 = vrcp.f32 %v704_v47  ;;  %v716_v31 = vand.u32 2147483648, %v704_v47  ;;  %v714_v2 = vand.u32 2147483647, %v704_v47  ;;  %vm710_vm11 = vweird.f32 %v704_v47 }
 0x2ab   :  { %2267 = vrcp.f32 %v724_v48  ;;  %v736_v54 = vand.u32 2147483648, %v724_v48  ;;  %vm730_vm15 = vweird.f32 %v724_v48  ;;  %v734_v36 = vand.u32 2147483647, %v724_v48 }
 0x2ac   :  { %v717_v26 = vor.u32 1.1754944e-38, %v716_v31  ;;  %vm715_vm13 = vcmp.eq.f32.partialorder %v714_v2, 8.507059e+37  ;;  %v3204_v31 = vld [vmem:[#allocation10 + $0xd0] sm:$0xff]  ;;  %v3208_v2 = vld [vmem:[#allocation10 + $0xb8] sm:$0xff] }
 0x2ad   :  { %v737_v46 = vor.u32 1.1754944e-38, %v736_v54  ;;  %vm735_vm1 = vcmp.eq.f32.partialorder %v734_v36, 8.507059e+37 }
 0x2b0   :  { %v2266_v51 = vpop.eup %2265 }
 0x2b1   :  { %v2268_v52 = vpop.eup %2267  ;;  %v706_v58 = vmul.f32 %v2266_v51, %v704_v47  ;;  %vm711_vm10 = vweird.f32 %v2266_v51  ;;  %v3194_v47 = vld [vmem:[#allocation10 + $0x118] sm:$0xff] }
 0x2b2   :  { %v726_v12 = vmul.f32 %v2268_v52, %v724_v48  ;;  %vm712_vm12 = vmor %vm710_vm11, %vm711_vm10  ;;  %vm731_vm14 = vweird.f32 %v2268_v52  ;;  %v2324_v48 = vld [vmem:[#allocation10 + $0x108] sm:$0xff] }
 0x2b3   :  { %v707_v9 = vsub.f32 1.0, %v706_v58  ;;  %vm732_vm0 = vmor %vm730_vm15, %vm731_vm14  ;;  %v2327_v58 = vld [vmem:[#allocation10 + $0xf0] sm:$0xff] }
 0x2b4   :  { %v727_v55 = vsub.f32 1.0, %v726_v12  ;;  %v2328_v12 = vld [vmem:[#allocation10 + $0xf8] sm:$0xff] }
 0x2b5   :  { %v708_v33 = vmul.f32 %v2266_v51, %v707_v9  ;;  %v3200_v9 = vld [vmem:[#allocation10 + $0xe8] sm:$0xff] }
 0x2b6   :  { %v728_v49 = vmul.f32 %v2268_v52, %v727_v55  ;;  %v2330_v55 = vld [vmem:[#allocation10 + $0xd8] sm:$0xff] }
 0x2b7   :  { %v709_v56 = vadd.f32 %v2266_v51, %v708_v33  ;;  %v2332_v33 = vld [vmem:[#allocation10 + $0xc0] sm:$0xff] }
 0x2b8   :  { %v729_v59 = vadd.f32 %v2268_v52, %v728_v49  ;;  %v2334_v49 = vld [vmem:[#allocation10 + $0xa8] sm:$0xff] }
 0x2b9   :  { %v713_v35 = vsel %vm712_vm12, %v2266_v51, %v709_v56  ;;  %v2325_v51 = vld [vmem:[#allocation10 + $0x110] sm:$0xff]  ;;  %v3216_v56 = vld [vmem:[#allocation10 + $0x88] sm:$0xff] }
 0x2ba   :  { %v718_v21 = vsel %vm715_vm13, %v717_v26, %v713_v35  ;;  %v733_v41 = vsel %vm732_vm0, %v2268_v52, %v729_v59  ;;  %v3197_v52 = vld [vmem:[#allocation10 + $0x100] sm:$0xff] }
 0x2bb   :  { %v741_v4 = vmul.f32 %v740_v8, %v718_v21  ;;  %v738_v63 = vsel %vm735_vm1, %v737_v46, %v733_v41  ;;  %v2339_v26 = vld [vmem:[#allocation10 + $0x60] sm:$0xff] }
 0x2bc   :  { %v744_v6 = vsub.f32 1.0, %v738_v63  ;;  %v746_v24 = vmul.f32 %v738_v63, %v3116_v53  ;;  %v2315_v53 = vld [vmem:[#allocation10 + $0x150] sm:$0xff] }
 0x2bd   :  { %v742_v18 = vadd.f32 %v741_v4, %v318_v50 }
 0x2bf   :  { %2269 = vtanh.f32 %v742_v18 }
 0x2c5   :  { %v2270_v14 = vpop.eup %2269 }
 0x2c6   :  { %v745_v19 = vmul.f32 %v2270_v14, %v744_v6 }
 0x2c8   :  { %v3177_v28 = vadd.f32 %v746_v24, %v745_v19 }
 0x2ca   :  { %764 = vmatmul.f32.vlgmr.msra.gmra.mxu3 %v3177_v28  ;;  %784 = vmatmul.f32.vlgmr.msrb.gmra.mxu0 %v3177_v28 }
 0x2cb   :  { %804 = vmatmul.f32.vlgmr.msrb.gmra.mxu1 %v3177_v28  ;;  %1004 = vmatpush.msra.mxu3 %v3182_v29 }
 0x2cc   :  { %1072 = vmatpush.msrb.mxu0 %v2312_v32  ;;  %1092 = vmatpush.msrb.mxu1 %v2313_v34 }
 0x2cd   :  { %1005 = vmatpush.msra.mxu3 %v3185_v37 }
 0x2ce   :  { %1073 = vmatpush.msrb.mxu0 %v2315_v53  ;;  %1093 = vmatpush.msrb.mxu1 %v2316_v38 }
 0x2cf   :  { %1006 = vmatpush.msra.mxu3 %v3188_v39 }
 0x2d0   :  { %1074 = vmatpush.msrb.mxu0 %v2318_v40  ;;  %1094 = vmatpush.msrb.mxu1 %v2319_v42  ;;  %v3416_v42 = vld [vmem:[#allocation57_spill] sm:$0xff] }
 0x2d1   :  { %1007 = vmatpush.msra.mxu3 %v3191_v43 }
 0x2d2   :  { %1075 = vmatpush.msrb.mxu0 %v2321_v44  ;;  %1095 = vmatpush.msrb.mxu1 %v2322_v45  ;;  %v321_v44 = vadd.f32 %v3416_v42, %v2925_v60 }
 0x2d3   :  { %1008 = vmatpush.msra.mxu3 %v3194_v47 }
 0x2d4   :  { %1076 = vmatpush.msrb.mxu0 %v2324_v48  ;;  %1096 = vmatpush.msrb.mxu1 %v2325_v51 }
 0x2d5   :  { %1009 = vmatpush.msra.mxu3 %v3197_v52 }
 0x2d6   :  { %1077 = vmatpush.msrb.mxu0 %v2327_v58  ;;  %1097 = vmatpush.msrb.mxu1 %v2328_v12 }
 0x2d7   :  { %1010 = vmatpush.msra.mxu3 %v3200_v9 }
 0x2d8   :  { %1078 = vmatpush.msrb.mxu0 %v2330_v55  ;;  %1098 = vmatpush.msrb.mxu1 %v2839_v57  ;;  %v2336_v57 = vld [vmem:[#allocation10 + $0x90] sm:$0xff] }
 0x2d9   :  { %1011 = vmatpush.msra.mxu3 %v3204_v31 }
 0x2da   :  { %1079 = vmatpush.msrb.mxu0 %v2332_v33  ;;  %1099 = vmatpush.msrb.mxu1 %v2847_v61  ;;  %v2338_v61 = vld [vmem:[#allocation10 + $0x78] sm:$0xff] }
 0x2db   :  { %1012 = vmatpush.msra.mxu3 %v3208_v2 }
 0x2dc   :  { %1080 = vmatpush.msrb.mxu0 %v2334_v49  ;;  %1100 = vmatpush.msrb.mxu1 %v2856_v0  ;;  %v2340_v0 = vld [vmem:[#allocation10 + $0x48] sm:$0xff] }
 0x2dd   :  { %1013 = vmatpush.msra.mxu3 %v3212_v20 }
 0x2de   :  { %1081 = vmatpush.msrb.mxu0 %v2336_v57  ;;  %1101 = vmatpush.msrb.mxu1 %v2867_v3  ;;  %v2341_v3 = vld [vmem:[#allocation10 + $0x30] sm:$0xff] }
 0x2df   :  { %1014 = vmatpush.msra.mxu3 %v3216_v56 }
 0x2e0   :  { %1082 = vmatpush.msrb.mxu0 %v2338_v61  ;;  %1102 = vmatpush.msrb.mxu1 %v2874_v5  ;;  %v2342_v5 = vld [vmem:[#allocation10 + $0x18] sm:$0xff] }
 0x2e1   :  { %1015 = vmatpush.msra.mxu3 %v2849_v62  ;;  %v2343_v62 = vld [vmem:[#allocation10] sm:$0xff] }
 0x2e2   :  { %1083 = vmatpush.msrb.mxu0 %v2339_v26  ;;  %1103 = vmatpush.msrb.mxu1 %v2882_v7 }
 0x2e3   :  { %1016 = vmatpush.msra.mxu3 %v2858_v1  ;;  %v3414_v1 = vld [vmem:[#allocation33_spill] sm:$0xff] }
 0x2e4   :  { %1084 = vmatpush.msrb.mxu0 %v2340_v0  ;;  %1104 = vmatpush.msrb.mxu1 %v3399_v11  ;;  %v280_v7 = vadd.f32 %v3414_v1, %v3411_v30 }
 0x2e5   :  { %1017 = vmatpush.msra.mxu3 %v3400_v13 }
 0x2e6   :  { %1085 = vmatpush.msrb.mxu0 %v2341_v3  ;;  %1105 = vmatpush.msrb.mxu1 %v3402_v16  ;;  %v3415_v16 = vld [vmem:[#allocation51_spill] sm:$0xff] }
 0x2e7   :  { %1018 = vmatpush.msra.mxu3 %v3403_v17  ;;  %v239_v8 = vadd.f32 %v3415_v16, %v3409_v27 }
 0x2e8   :  { %1086 = vmatpush.msrb.mxu0 %v2342_v5  ;;  %1106 = vmatpush.msrb.mxu1 %v3405_v22 }
 0x2e9   :  { %1019 = vmatpush.msra.mxu3 %v3406_v23 }
 0x2ea   :  { %1087 = vmatpush.msrb.mxu0 %v2343_v62  ;;  %1107 = vmatpush.msrb.mxu1 %v3408_v25 }
 0x347   :  { %v785_v11 = vpop.f32.mrf.mxu0 }
 0x348   :  { %v828_v13 = vadd.f32 %v785_v11, %v280_v7  ;;  %v805_v19 = vpop.f32.mrf.mxu1 }
 0x349   :  { %v848_v34 = vadd.f32 %v3398_v10, %v805_v19 }
 0x34a   :  { %v1874_v35 = vmul.f32 -1.442695, %v828_v13 }
 0x34c   :  { %2271 = vpow2.f32 %v1874_v35 }
 0x34d   :  { %v765_v17 = vpop.f32.mrf.mxu3 }
 0x34e   :  { %v808_v21 = vadd.f32 %v765_v17, %v239_v8 }
 0x350   :  { %v1873_v59 = vmul.f32 -1.442695, %v808_v21 }
 0x352   :  { %v2272_v22 = vpop.eup %2271  ;;  %2273 = vpow2.f32 %v1873_v59 }
 0x353   :  { %v832_v23 = vadd.f32 1.0, %v2272_v22 }
 0x355   :  { %2275 = vrcp.f32 %v832_v23  ;;  %v844_v45 = vand.u32 2147483648, %v832_v23  ;;  %vm838_vm7 = vweird.f32 %v832_v23  ;;  %v842_v51 = vand.u32 2147483647, %v832_v23 }
 0x357   :  { %v845_v55 = vor.u32 1.1754944e-38, %v844_v45  ;;  %vm843_vm9 = vcmp.eq.f32.partialorder %v842_v51, 8.507059e+37  ;;  %v3420_v51 = vld [vmem:[#allocation54_spill] sm:$0xff] }
 0x358   :  { %v2274_v15 = vpop.eup %2273 }
 0x359   :  { %v812_v50 = vadd.f32 1.0, %v2274_v15 }
 0x35b   :  { %2277 = vrcp.f32 %v812_v50  ;;  %v2276_v25 = vpop.eup %2275  ;;  %v824_v46 = vand.u32 2147483648, %v812_v50  ;;  %v822_v6 = vand.u32 2147483647, %v812_v50  ;;  %vm818_vm3 = vweird.f32 %v812_v50 }
 0x35c   :  { %v834_v4 = vmul.f32 %v2276_v25, %v832_v23  ;;  %vm839_vm6 = vweird.f32 %v2276_v25 }
 0x35d   :  { %v825_v32 = vor.u32 1.1754944e-38, %v824_v46  ;;  %vm823_vm5 = vcmp.eq.f32.partialorder %v822_v6, 8.507059e+37  ;;  %vm840_vm8 = vmor %vm838_vm7, %vm839_vm6 }
 0x35e   :  { %v835_v18 = vsub.f32 1.0, %v834_v4 }
 0x360   :  { %v836_v14 = vmul.f32 %v2276_v25, %v835_v18 }
 0x361   :  { %v2278_v54 = vpop.eup %2277 }
 0x362   :  { %v814_v36 = vmul.f32 %v2278_v54, %v812_v50  ;;  %vm819_vm2 = vweird.f32 %v2278_v54  ;;  %v837_v40 = vadd.f32 %v2276_v25, %v836_v14 }
 0x363   :  { %vm820_vm4 = vmor %vm818_vm3, %vm819_vm2 }
 0x364   :  { %v815_v41 = vsub.f32 1.0, %v814_v36  ;;  %v841_v12 = vsel %vm840_vm8, %v2276_v25, %v837_v40 }
 0x365   :  { %v846_v33 = vsel %vm843_vm9, %v845_v55, %v841_v12 }
 0x366   :  { %v816_v63 = vmul.f32 %v2278_v54, %v815_v41  ;;  %v852_v10 = vsub.f32 1.0, %v846_v33  ;;  %v854_v61 = vmul.f32 %v846_v33, %v3177_v28  ;;  %v2344_v28 = vld [vmem:[#allocation10 + $0x70] sm:$0xff] }
 0x368   :  { %v817_v24 = vadd.f32 %v2278_v54, %v816_v63  ;;  %v3419_v63 = vld [vmem:[#allocation58_spill] sm:$0xff] }
 0x369   :  { %v324_v6 = vadd.f32 %v3419_v63, %v2925_v60 }
 0x36a   :  { %v821_v53 = vsel %vm820_vm4, %v2278_v54, %v817_v24  ;;  %v3258_v54 = vld [vmem:[#allocation12 + $0x5] ss:$0 sm:$0xff] }
 0x36b   :  { %v826_v38 = vsel %vm823_vm5, %v825_v32, %v821_v53 }
 0x36c   :  { %v849_v48 = vmul.f32 %v848_v34, %v826_v38 }
 0x36e   :  { %v850_v58 = vadd.f32 %v849_v48, %v321_v44 }
 0x370   :  { %2279 = vtanh.f32 %v850_v58  ;;  %v245_v58 = vadd.f32 %v3420_v51, %v3409_v27 }
 0x376   :  { %v2280_v49 = vpop.eup %2279 }
 0x377   :  { %v853_v57 = vmul.f32 %v2280_v49, %v852_v10  ;;  %v3421_v10 = vld [vmem:[#allocation50_spill] sm:$0xff] }
 0x378   :  { %v286_v49 = vadd.f32 %v3421_v10, %v3411_v30 }
 0x379   :  { %v3238_v26 = vadd.f32 %v854_v61, %v853_v57 }
 0x37b   :  { %872 = vmatmul.f32.vlgmr.msrb.gmra.mxu2 %v3238_v26  ;;  %892 = vmatmul.f32.vlgmr.msrb.gmra.mxu3 %v3238_v26 }
 0x37c   :  { %912 = vmatmul.f32.vlgmr.msra.gmra.mxu0 %v3238_v26  ;;  %1112 = vmatpush.msrb.mxu2 %v3182_v29  ;;  %v2345_v29 = vld [vmem:[#allocation10 + $0x58] sm:$0xff] }
 0x37e   :  { %1113 = vmatpush.msrb.mxu2 %v3185_v37  ;;  %v2346_v37 = vld [vmem:[#allocation10 + $0x40] sm:$0xff] }
 0x380   :  { %1114 = vmatpush.msrb.mxu2 %v3188_v39  ;;  %v2347_v39 = vld [vmem:[#allocation10 + $0x28] sm:$0xff] }
 0x382   :  { %1115 = vmatpush.msrb.mxu2 %v3191_v43  ;;  %v2348_v43 = vld [vmem:[#allocation10 + $0x10] sm:$0xff] }
 0x384   :  { %1116 = vmatpush.msrb.mxu2 %v3194_v47  ;;  %v3417_v47 = vld [vmem:[#allocation53_spill] sm:$0xff] }
 0x386   :  { %1117 = vmatpush.msrb.mxu2 %v3197_v52  ;;  %v242_v52 = vadd.f32 %v3417_v47, %v3409_v27 }
 0x388   :  { %1118 = vmatpush.msrb.mxu2 %v3200_v9  ;;  %v3418_v9 = vld [vmem:[#allocation48_spill] sm:$0xff] }
 0x38a   :  { %1119 = vmatpush.msrb.mxu2 %v3204_v31  ;;  %v283_v31 = vadd.f32 %v3418_v9, %v3411_v30 }
 0x38c   :  { %1120 = vmatpush.msrb.mxu2 %v3208_v2 }
 0x38e   :  { %1121 = vmatpush.msrb.mxu2 %v3212_v20 }
 0x390   :  { %1122 = vmatpush.msrb.mxu2 %v3216_v56 }
 0x392   :  { %1123 = vmatpush.msrb.mxu2 %v2344_v28 }
 0x394   :  { %1124 = vmatpush.msrb.mxu2 %v2345_v29 }
 0x396   :  { %1125 = vmatpush.msrb.mxu2 %v2346_v37 }
 0x398   :  { %1126 = vmatpush.msrb.mxu2 %v2347_v39 }
 0x39a   :  { %1127 = vmatpush.msrb.mxu2 %v2348_v43 }
 0x3f9   :  { %v913_v15 = vpop.f32.mrf.mxu0 }
 0x3fa   :  { %v956_v36 = vadd.f32 %v3258_v54, %v913_v15 }
 0x3fe   :  { %v873_v2 = vpop.f32.mrf.mxu2  ;;  %v893_v20 = vpop.f32.mrf.mxu3 }
 0x3ff   :  { %v916_v0 = vadd.f32 %v873_v2, %v242_v52  ;;  %v936_v56 = vadd.f32 %v893_v20, %v283_v31 }
 0x401   :  { %v1875_v3 = vmul.f32 -1.442695, %v916_v0  ;;  %v1876_v5 = vmul.f32 -1.442695, %v936_v56 }
 0x403   :  { %2281 = vpow2.f32 %v1875_v3 }
 0x404   :  { %2283 = vpow2.f32 %v1876_v5 }
 0x409   :  { %v2282_v62 = vpop.eup %2281 }
 0x40a   :  { %v2284_v1 = vpop.eup %2283  ;;  %v920_v7 = vadd.f32 1.0, %v2282_v62 }
 0x40b   :  { %v940_v11 = vadd.f32 1.0, %v2284_v1 }
 0x40c   :  { %2285 = vrcp.f32 %v920_v7  ;;  %v932_v21 = vand.u32 2147483648, %v920_v7  ;;  %v930_v23 = vand.u32 2147483647, %v920_v7  ;;  %vm926_vm11 = vweird.f32 %v920_v7 }
 0x40d   :  { %2287 = vrcp.f32 %v940_v11  ;;  %v952_v14 = vand.u32 2147483648, %v940_v11  ;;  %vm946_vm15 = vweird.f32 %v940_v11  ;;  %v950_v24 = vand.u32 2147483647, %v940_v11 }
 0x40e   :  { %v933_v4 = vor.u32 1.1754944e-38, %v932_v21  ;;  %vm931_vm13 = vcmp.eq.f32.partialorder %v930_v23, 8.507059e+37 }
 0x40f   :  { %v953_v53 = vor.u32 1.1754944e-38, %v952_v14  ;;  %vm951_vm1 = vcmp.eq.f32.partialorder %v950_v24, 8.507059e+37 }
 0x412   :  { %v2286_v13 = vpop.eup %2285 }
 0x413   :  { %v2288_v35 = vpop.eup %2287  ;;  %v922_v16 = vmul.f32 %v2286_v13, %v920_v7  ;;  %vm927_vm10 = vweird.f32 %v2286_v13 }
 0x414   :  { %v942_v8 = vmul.f32 %v2288_v35, %v940_v11  ;;  %vm928_vm12 = vmor %vm926_vm11, %vm927_vm10  ;;  %vm947_vm14 = vweird.f32 %v2288_v35  ;;  %v3422_v11 = vld [vmem:[#allocation59_spill] sm:$0xff] }
 0x415   :  { %v923_v17 = vsub.f32 1.0, %v922_v16  ;;  %vm948_vm0 = vmor %vm946_vm15, %vm947_vm14 }
 0x416   :  { %v943_v59 = vsub.f32 1.0, %v942_v8 }
 0x417   :  { %v924_v22 = vmul.f32 %v2286_v13, %v923_v17 }
 0x418   :  { %v944_v50 = vmul.f32 %v2288_v35, %v943_v59 }
 0x419   :  { %v925_v25 = vadd.f32 %v2286_v13, %v924_v22 }
 0x41a   :  { %v945_v46 = vadd.f32 %v2288_v35, %v944_v50 }
 0x41b   :  { %v929_v18 = vsel %vm928_vm12, %v2286_v13, %v925_v25  ;;  %v327_v13 = vadd.f32 %v3422_v11, %v2925_v60 }
 0x41c   :  { %v934_v41 = vsel %vm931_vm13, %v933_v4, %v929_v18  ;;  %v949_v34 = vsel %vm948_vm0, %v2288_v35, %v945_v46  ;;  %v3423_v46 = vld [vmem:[#allocation55_spill] sm:$0xff] }
 0x41d   :  { %v957_v19 = vmul.f32 %v956_v36, %v934_v41  ;;  %v954_v38 = vsel %vm951_vm1, %v953_v53, %v949_v34  ;;  %v248_v63 = vadd.f32 %v3423_v46, %v3409_v27 }
 0x41e   :  { %v960_v40 = vsub.f32 1.0, %v954_v38  ;;  %v962_v45 = vmul.f32 %v954_v38, %v3238_v26 }
 0x41f   :  { %v958_v32 = vadd.f32 %v957_v19, %v324_v6  ;;  %v3424_v6 = vld [vmem:[#allocation52_spill] sm:$0xff] }
 0x420   :  { %v289_v14 = vadd.f32 %v3424_v6, %v3411_v30 }
 0x421   :  { %2289 = vtanh.f32 %v958_v32 }
 0x427   :  { %v2290_v42 = vpop.eup %2289 }
 0x428   :  { %v961_v44 = vmul.f32 %v2290_v42, %v960_v40 }
 0x42a   :  { %v963_v48 = vadd.f32 %v962_v45, %v961_v44 }
 0x42c   :  { %980 = vmatmul.f32.vlgmr.msra.gmra.mxu1 %v963_v48  ;;  %1000 = vmatmul.f32.vlgmr.msra.gmra.mxu2 %v963_v48 }
 0x42d   :  { %1020 = vmatmul.f32.vlgmr.msra.gmra.mxu3 %v963_v48 }
 0x4a9   :  { %v981_v12 = vpop.f32.mrf.mxu1 }
 0x4aa   :  { %v1024_v55 = vadd.f32 %v981_v12, %v245_v58 }
 0x4ac   :  { %v1877_v33 = vmul.f32 -1.442695, %v1024_v55 }
 0x4ae   :  { %2291 = vpow2.f32 %v1877_v33 }
 0x4af   :  { %v1001_v57 = vpop.f32.mrf.mxu2 }
 0x4b0   :  { %v1044_v61 = vadd.f32 %v1001_v57, %v286_v49  ;;  %v1021_v0 = vpop.f32.mrf.mxu3 }
 0x4b1   :  { %v1064_v7 = vadd.f32 %v3258_v54, %v1021_v0 }
 0x4b2   :  { %v1878_v28 = vmul.f32 -1.442695, %v1044_v61 }
 0x4b4   :  { %v2292_v29 = vpop.eup %2291  ;;  %2293 = vpow2.f32 %v1878_v28 }
 0x4b5   :  { %v1028_v26 = vadd.f32 1.0, %v2292_v29 }
 0x4b7   :  { %2295 = vrcp.f32 %v1028_v26  ;;  %v1040_v9 = vand.u32 2147483648, %v1028_v26  ;;  %v1038_v2 = vand.u32 2147483647, %v1028_v26  ;;  %vm1034_vm3 = vweird.f32 %v1028_v26 }
 0x4b9   :  { %v1041_v5 = vor.u32 1.1754944e-38, %v1040_v9  ;;  %vm1039_vm5 = vcmp.eq.f32.partialorder %v1038_v2, 8.507059e+37 }
 0x4ba   :  { %v2294_v37 = vpop.eup %2293 }
 0x4bb   :  { %v1048_v39 = vadd.f32 1.0, %v2294_v37 }
 0x4bd   :  { %v2296_v43 = vpop.eup %2295  ;;  %2297 = vrcp.f32 %v1048_v39  ;;  %v1060_v17 = vand.u32 2147483648, %v1048_v39  ;;  %v1058_v21 = vand.u32 2147483647, %v1048_v39  ;;  %vm1054_vm7 = vweird.f32 %v1048_v39 }
 0x4be   :  { %v1030_v47 = vmul.f32 %v2296_v43, %v1028_v26  ;;  %vm1035_vm2 = vweird.f32 %v2296_v43 }
 0x4bf   :  { %vm1036_vm4 = vmor %vm1034_vm3, %vm1035_vm2  ;;  %v1061_v15 = vor.u32 1.1754944e-38, %v1060_v17  ;;  %vm1059_vm9 = vcmp.eq.f32.partialorder %v1058_v21, 8.507059e+37 }
 0x4c0   :  { %v1031_v52 = vsub.f32 1.0, %v1030_v47 }
 0x4c2   :  { %v1032_v31 = vmul.f32 %v2296_v43, %v1031_v52 }
 0x4c3   :  { %v2298_v20 = vpop.eup %2297 }
 0x4c4   :  { %v1050_v56 = vmul.f32 %v2298_v20, %v1048_v39  ;;  %v1033_v3 = vadd.f32 %v2296_v43, %v1032_v31  ;;  %vm1055_vm6 = vweird.f32 %v2298_v20 }
 0x4c5   :  { %vm1056_vm8 = vmor %vm1054_vm7, %vm1055_vm6 }
 0x4c6   :  { %v1051_v62 = vsub.f32 1.0, %v1050_v56  ;;  %v1037_v1 = vsel %vm1036_vm4, %v2296_v43, %v1033_v3  ;;  %v3425_v43 = vld [vmem:[#allocation61_spill] sm:$0xff] }
 0x4c7   :  { %v1042_v35 = vsel %vm1039_vm5, %v1041_v5, %v1037_v1  ;;  %v330_v47 = vadd.f32 %v3425_v43, %v2925_v60 }
 0x4c8   :  { %v1052_v16 = vmul.f32 %v2298_v20, %v1051_v62  ;;  %v1065_v8 = vmul.f32 %v1064_v7, %v1042_v35 }
 0x4ca   :  { %v1066_v59 = vadd.f32 %v1065_v8, %v327_v13  ;;  %v1053_v22 = vadd.f32 %v2298_v20, %v1052_v16 }
 0x4cc   :  { %2299 = vtanh.f32 %v1066_v59  ;;  %v1057_v23 = vsel %vm1056_vm8, %v2298_v20, %v1053_v22 }
 0x4cd   :  { %v1062_v50 = vsel %vm1059_vm9, %v1061_v15, %v1057_v23 }
 0x4ce   :  { %v1068_v25 = vsub.f32 1.0, %v1062_v50  ;;  %v1070_v18 = vmul.f32 %v1062_v50, %v963_v48 }
 0x4d2   :  { %v2300_v4 = vpop.eup %2299 }
 0x4d3   :  { %v1069_v36 = vmul.f32 %v2300_v4, %v1068_v25 }
 0x4d5   :  { %v3271_v41 = vadd.f32 %v1070_v18, %v1069_v36 }
 0x4d7   :  { %1088 = vmatmul.f32.vlgmr.msrb.gmra.mxu0 %v3271_v41  ;;  %1108 = vmatmul.f32.vlgmr.msrb.gmra.mxu1 %v3271_v41 }
 0x4d8   :  { %1128 = vmatmul.f32.vlgmr.msrb.gmra.mxu2 %v3271_v41 }
 0x554   :  { %v1089_v19 = vpop.f32.mrf.mxu0  ;;  %v1109_v24 = vpop.f32.mrf.mxu1 }
 0x555   :  { %v1132_v32 = vadd.f32 %v1089_v19, %v248_v63  ;;  %v1152_v34 = vadd.f32 %v1109_v24, %v289_v14 }
 0x557   :  { %v1879_v53 = vmul.f32 -1.442695, %v1132_v32  ;;  %v1880_v38 = vmul.f32 -1.442695, %v1152_v34 }
 0x559   :  { %2301 = vpow2.f32 %v1879_v53 }
 0x55a   :  { %2303 = vpow2.f32 %v1880_v38 }
 0x55b   :  { %v1129_v57 = vpop.f32.mrf.mxu2 }
 0x55c   :  { %v1172_v26 = vadd.f32 %v3258_v54, %v1129_v57 }
 0x55f   :  { %v2302_v40 = vpop.eup %2301 }
 0x560   :  { %v2304_v42 = vpop.eup %2303  ;;  %v1136_v44 = vadd.f32 1.0, %v2302_v40 }
 0x561   :  { %v1156_v45 = vadd.f32 1.0, %v2304_v42 }
 0x562   :  { %2305 = vrcp.f32 %v1136_v44  ;;  %v1148_v55 = vand.u32 2147483648, %v1136_v44  ;;  %v1146_v10 = vand.u32 2147483647, %v1136_v44  ;;  %vm1142_vm11 = vweird.f32 %v1136_v44 }
 0x563   :  { %2307 = vrcp.f32 %v1156_v45  ;;  %v1168_v52 = vand.u32 2147483648, %v1156_v45  ;;  %vm1162_vm15 = vweird.f32 %v1156_v45  ;;  %v1166_v31 = vand.u32 2147483647, %v1156_v45 }
 0x564   :  { %v1149_v28 = vor.u32 1.1754944e-38, %v1148_v55  ;;  %vm1147_vm13 = vcmp.eq.f32.partialorder %v1146_v10, 8.507059e+37 }
 0x565   :  { %v1169_v0 = vor.u32 1.1754944e-38, %v1168_v52  ;;  %vm1167_vm1 = vcmp.eq.f32.partialorder %v1166_v31, 8.507059e+37 }
 0x568   :  { %v2306_v48 = vpop.eup %2305 }
 0x569   :  { %v2308_v51 = vpop.eup %2307  ;;  %v1138_v27 = vmul.f32 %v2306_v48, %v1136_v44  ;;  %vm1143_vm10 = vweird.f32 %v2306_v48 }
 0x56a   :  { %v1158_v58 = vmul.f32 %v2308_v51, %v1156_v45  ;;  %vm1144_vm12 = vmor %vm1142_vm11, %vm1143_vm10  ;;  %vm1163_vm14 = vweird.f32 %v2308_v51 }
 0x56b   :  { %v1139_v12 = vsub.f32 1.0, %v1138_v27  ;;  %vm1164_vm0 = vmor %vm1162_vm15, %vm1163_vm14 }
 0x56c   :  { %v1159_v30 = vsub.f32 1.0, %v1158_v58 }
 0x56d   :  { %v1140_v33 = vmul.f32 %v2306_v48, %v1139_v12 }
 0x56e   :  { %v1160_v49 = vmul.f32 %v2308_v51, %v1159_v30 }
 0x56f   :  { %v1141_v61 = vadd.f32 %v2306_v48, %v1140_v33 }
 0x570   :  { %v1161_v37 = vadd.f32 %v2308_v51, %v1160_v49 }
 0x571   :  { %v1145_v29 = vsel %vm1144_vm12, %v2306_v48, %v1141_v61 }
 0x572   :  { %v1150_v39 = vsel %vm1147_vm13, %v1149_v28, %v1145_v29  ;;  %v1165_v20 = vsel %vm1164_vm0, %v2308_v51, %v1161_v37 }
 0x573   :  { %v1173_v9 = vmul.f32 %v1172_v26, %v1150_v39  ;;  %v1170_v56 = vsel %vm1167_vm1, %v1169_v0, %v1165_v20 }
 0x574   :  { %v1176_v3 = vsub.f32 1.0, %v1170_v56  ;;  %v1178_v62 = vmul.f32 %v1170_v56, %v3271_v41 }
 0x575   :  { %v1174_v2 = vadd.f32 %v1173_v9, %v330_v47 }
 0x577   :  { %2309 = vtanh.f32 %v1174_v2 }
 0x57d   :  { %v2310_v5 = vpop.eup %2309 }
 0x57e   :  { %v1177_v54 = vmul.f32 %v2310_v5, %v1176_v3 }
 0x580   :  { %v3293_v1 = vadd.f32 %v1178_v62, %v1177_v54 }
 0x581   :  { %2551 = dma.done.wait [#allocation6], 256 }
 0x582   :  { %2552 = vsyncadd [#allocation6], 4294967040 }
 0x583   :  { %2553 = dma.done.wait [#allocation6 + $0x1], 2048 }
 0x584   :  { %2554 = vsyncadd [#allocation6 + $0x1], 4294965248  ;;  %v1939_v60 = vld [vmem:[#allocation3 + $0x70] sm:$0xf]  ;;  %v2168_v7 = vld [vmem:[#allocation3 + $0x74] sm:$0xf0]  ;;  %v1192_v20 = vpack.c.bf16 %v3293_v1, %v3293_v1 }
 0x585   :  { %v2167_v11 = vld [vmem:[#allocation3 + $0x74] sm:$0xf]  ;;  %v1940_v13 = vor.u32 %v2168_v7, %v1939_v60  ;;  %v1941_v35 = vld [vmem:[#allocation3 + $0x78] sm:$0xf0]  ;;  %v1931_v16 = vld [vmem:[#allocation3 + $0x60] sm:$0xf] }
 0x586   :  { %v2166_v8 = vld [vmem:[#allocation3 + $0x64] sm:$0xf0]  ;;  %v1944_v17 = vor.u32 %v2167_v11, %v1941_v35  ;;  %v2165_v21 = vld [vmem:[#allocation3 + $0x64] sm:$0xf]  ;;  %v1933_v59 = vld [vmem:[#allocation3 + $0x68] sm:$0xf0] }
 0x587   :  { %1289 = vmatpush.bf16.msrb.mxu3 %v1940_v13  ;;  %v1932_v22 = vor.u32 %v2166_v8, %v1931_v16  ;;  %v1923_v23 = vld [vmem:[#allocation3 + $0x50] sm:$0xf]  ;;  %v1936_v15 = vor.u32 %v2165_v21, %v1933_v59  ;;  %v2164_v50 = vld [vmem:[#allocation3 + $0x54] sm:$0xf0]  ;;  %v2163_v36 = vld [vmem:[#allocation3 + $0x54] sm:$0xf] }
 0x588   :  { %1302 = vmatpush.bf16.msra.mxu0 %v1944_v17  ;;  %v1947_v25 = vld [vmem:[#allocation2] sm:$0xf]  ;;  %v2152_v4 = vld [vmem:[#allocation2 + $0x4] sm:$0xf0]  ;;  %v1925_v18 = vld [vmem:[#allocation3 + $0x58] sm:$0xf0]  ;;  %v1924_v63 = vor.u32 %v2164_v50, %v1923_v23 }
 0x589   :  { %v1948_v41 = vor.u32 %v2152_v4, %v1947_v25  ;;  %v1188_v46 = vld [vmem:[#allocation7] sm:$0xff]  ;;  %vm1325_vm2 = vcmask 130048   ;;  %v1928_v14 = vor.u32 %v2163_v36, %v1925_v18  ;;  %v2162_v24 = vld [vmem:[#allocation3 + $0x44] sm:$0xf0]  ;;  %v1917_v34 = vld [vmem:[#allocation3 + $0x48] sm:$0xf0] }
 0x58a   :  { %v1189_v6 = vpack.c.bf16 %v1188_v46, %v1188_v46  ;;  %v1915_v19 = vld [vmem:[#allocation3 + $0x40] sm:$0xf]  ;;  %v2161_v32 = vld [vmem:[#allocation3 + $0x44] sm:$0xf]  ;;  %v2151_v53 = vld [vmem:[#allocation2 + $0x4] sm:$0xf] }
 0x58b   :  { %1290 = vmatpush.bf16.msrb.mxu3 %v1932_v22  ;;  %1336 = vmatpush.bf16.msra.mxu1 %v1948_v41  ;;  %v1949_v38 = vld [vmem:[#allocation2 + $0x8] sm:$0xf0]  ;;  %v1916_v42 = vor.u32 %v2162_v24, %v1915_v19  ;;  %v1920_v44 = vor.u32 %v2161_v32, %v1917_v34  ;;  %v1907_v45 = vld [vmem:[#allocation3 + $0x30] sm:$0xf]  ;;  %v2160_v48 = vld [vmem:[#allocation3 + $0x34] sm:$0xf0] }
 0x58c   :  { %1303 = vmatpush.bf16.msra.mxu0 %v1936_v15  ;;  %v1952_v40 = vor.u32 %v2151_v53, %v1949_v38  ;;  %v2159_v51 = vld [vmem:[#allocation3 + $0x34] sm:$0xf]  ;;  %v1909_v27 = vld [vmem:[#allocation3 + $0x38] sm:$0xf0]  ;;  %v1908_v58 = vor.u32 %v2160_v48, %v1907_v45  ;;  %v1899_v30 = vld [vmem:[#allocation3 + $0x20] sm:$0xf] }
 0x58d   :  { %v1912_v12 = vor.u32 %v2159_v51, %v1909_v27  ;;  %v2158_v55 = vld [vmem:[#allocation3 + $0x24] sm:$0xf0]  ;;  %v2157_v33 = vld [vmem:[#allocation3 + $0x24] sm:$0xf]  ;;  %v1901_v10 = vld [vmem:[#allocation3 + $0x28] sm:$0xf0] }
 0x58e   :  { %1953 = vmatmul.msk.bf16.vlgmr.msra.gmra.mxu1 %vm1325_vm2, %v1189_v6  ;;  %v1900_v49 = vor.u32 %v2158_v55, %v1899_v30  ;;  %v1904_v57 = vor.u32 %v2157_v33, %v1901_v10  ;;  %v1891_v61 = vld [vmem:[#allocation3 + $0x10] sm:$0xf]  ;;  %v2156_v28 = vld [vmem:[#allocation3 + $0x14] sm:$0xf0]  ;;  %v2155_v29 = vld [vmem:[#allocation3 + $0x14] sm:$0xf] }
 0x58f   :  { %1291 = vmatpush.bf16.msrb.mxu3 %v1924_v63  ;;  %1349 = vmatpush.bf16.msrb.mxu1 %v1952_v40  ;;  %v1893_v26 = vld [vmem:[#allocation3 + $0x18] sm:$0xf0]  ;;  %v1892_v37 = vor.u32 %v2156_v28, %v1891_v61  ;;  %v1883_v43 = vld [vmem:[#allocation3] sm:$0xf]  ;;  %v2154_v47 = vld [vmem:[#allocation3 + $0x4] sm:$0xf0] }
 0x590   :  { %1304 = vmatpush.bf16.msra.mxu0 %v1928_v14  ;;  %v1896_v39 = vor.u32 %v2155_v29, %v1893_v26  ;;  %v2153_v52 = vld [vmem:[#allocation3 + $0x4] sm:$0xf]  ;;  %v1885_v9 = vld [vmem:[#allocation3 + $0x8] sm:$0xf0]  ;;  %v1884_v31 = vor.u32 %v2154_v47, %v1883_v43 }
 0x591   :  { %v1888_v2 = vor.u32 %v2153_v52, %v1885_v9  ;;  %v1355_v5 = vld [vmem:[#allocation13] ss:$4 sm:$0x3] }
 0x592   :  { %v1358_v54 = vperm.slane %v1355_v5, 1  ;;  %v1357_v13 = vperm.slane %v1355_v5, 0 }
 0x593   :  { %1292 = vmatpush.bf16.msrb.mxu3 %v1916_v42 }
 0x594   :  { %1305 = vmatpush.bf16.msra.mxu0 %v1920_v44 }
 0x597   :  { %1293 = vmatpush.bf16.msrb.mxu3 %v1908_v58 }
 0x598   :  { %1306 = vmatpush.bf16.msra.mxu0 %v1912_v12 }
 0x59b   :  { %1294 = vmatpush.bf16.msrb.mxu3 %v1900_v49 }
 0x59c   :  { %1307 = vmatpush.bf16.msra.mxu0 %v1904_v57 }
 0x59e   :  { %1954 = vmatmul.msk.bf16.vlgmr.msrb.gmra.mxu1 %vm1325_vm2, %v1189_v6 }
 0x59f   :  { %1295 = vmatpush.bf16.msrb.mxu3 %v1892_v37 }
 0x5a0   :  { %1308 = vmatpush.bf16.msra.mxu0 %v1896_v39 }
 0x5a3   :  { %1296 = vmatpush.bf16.msrb.mxu3 %v1884_v31 }
 0x5a4   :  { %1309 = vmatpush.bf16.msra.mxu0 %v1888_v2 }
 0x5a6   :  { %1297 = vmatmul.bf16.vlgmr.msrb.gmra.mxu3 %v1192_v20 }
 0x5a7   :  { %1310 = vmatmul.bf16.vlgmr.msra.gmra.mxu0 %v1192_v20 }
 0x60b   :  { %v1338_v0 = vpop.f32.mrf.mxu1 }
 0x613   :  { %v1340_v56 = vpop.f32.mrf.mxu1 }
 0x61b   :  { %v1351_v3 = vpop.f32.mrf.mxu1 }
 0x623   :  { %v1353_v62 = vpop.f32.mrf.mxu1 }
 0x624   :  { %v1311_v60 = vpop.f32.mrf.mxu0 }
 0x625   :  { %v1352_v7 = vadd.f32 %v1351_v3, %v1311_v60 }
 0x627   :  { %v3299_v11 = vadd.f32 %v1358_v54, %v1352_v7 }
 0x629   :  { %v1364_v35 = vmax.f32 %v3299_v11, 0.0  ;;  %v1298_v16 = vpop.f32.mrf.mxu3 }
 0x62a   :  { %v1339_v8 = vadd.f32 %v1338_v0, %v1298_v16 }
 0x62c   :  { %v3302_v1 = vadd.f32 %v1357_v13, %v1339_v8  ;;  %v1313_v17 = vpop.f32.mrf.mxu0 }
 0x62e   :  { %v1363_v21 = vmax.f32 %v3302_v1, 0.0 }
 0x631   :  { %v1300_v59 = vpop.f32.mrf.mxu3 }
 0x632   :  { %2555 = dma.done.wait [#allocation6 + $0x2], 4096 }
 0x633   :  { %2556 = vsyncadd [#allocation6 + $0x2], 4294963200  ;;  %v2013_v22 = vld [vmem:[#allocation4 + $0x70] sm:$0xf]  ;;  %v2184_v23 = vld [vmem:[#allocation4 + $0x74] sm:$0xf0] }
 0x634   :  { %v2077_v15 = vld [vmem:[#allocation4 + $0xf0] sm:$0xf]  ;;  %v2014_v50 = vor.u32 %v2184_v23, %v2013_v22  ;;  %v2200_v25 = vld [vmem:[#allocation4 + $0xf4] sm:$0xf0]  ;;  %v2183_v4 = vld [vmem:[#allocation4 + $0x74] sm:$0xf] }
 0x635   :  { %v2015_v36 = vld [vmem:[#allocation4 + $0x78] sm:$0xf0]  ;;  %v2078_v18 = vor.u32 %v2200_v25, %v2077_v15  ;;  %v2199_v46 = vld [vmem:[#allocation4 + $0xf4] sm:$0xf]  ;;  %v2005_v6 = vld [vmem:[#allocation4 + $0x60] sm:$0xf] }
 0x636   :  { %v2018_v41 = vor.u32 %v2183_v4, %v2015_v36  ;;  %v2079_v63 = vld [vmem:[#allocation4 + $0xf8] sm:$0xf0]  ;;  %1570 = vmatpush.bf16.msra.mxu1 %v2014_v50  ;;  %v2182_v19 = vld [vmem:[#allocation4 + $0x64] sm:$0xf0]  ;;  %v2069_v24 = vld [vmem:[#allocation4 + $0xe0] sm:$0xf] }
 0x637   :  { %v2082_v14 = vor.u32 %v2199_v46, %v2079_v63  ;;  %v2198_v32 = vld [vmem:[#allocation4 + $0xe4] sm:$0xf0]  ;;  %1583 = vmatpush.bf16.msra.mxu2 %v2078_v18  ;;  %v2006_v34 = vor.u32 %v2182_v19, %v2005_v6  ;;  %v2181_v38 = vld [vmem:[#allocation4 + $0x64] sm:$0xf]  ;;  %v2007_v40 = vld [vmem:[#allocation4 + $0x68] sm:$0xf0] }
 0x638   :  { %1596 = vmatpush.bf16.msra.mxu3 %v2018_v41  ;;  %v2070_v53 = vor.u32 %v2198_v32, %v2069_v24  ;;  %v2197_v42 = vld [vmem:[#allocation4 + $0xe4] sm:$0xf]  ;;  %v2010_v44 = vor.u32 %v2181_v38, %v2007_v40  ;;  %v2071_v45 = vld [vmem:[#allocation4 + $0xe8] sm:$0xf0]  ;;  %v1997_v48 = vld [vmem:[#allocation4 + $0x50] sm:$0xf] }
 0x639   :  { %1609 = vmatpush.bf16.msrb.mxu0 %v2082_v14  ;;  %v2180_v51 = vld [vmem:[#allocation4 + $0x54] sm:$0xf0]  ;;  %v2074_v27 = vor.u32 %v2197_v42, %v2071_v45  ;;  %v2061_v58 = vld [vmem:[#allocation4 + $0xd0] sm:$0xf]  ;;  %v2179_v30 = vld [vmem:[#allocation4 + $0x54] sm:$0xf] }
 0x63a   :  { %v2196_v12 = vld [vmem:[#allocation4 + $0xd4] sm:$0xf0]  ;;  %1571 = vmatpush.bf16.msra.mxu1 %v2006_v34  ;;  %v1998_v55 = vor.u32 %v2180_v51, %v1997_v48  ;;  %v1999_v33 = vld [vmem:[#allocation4 + $0x58] sm:$0xf0]  ;;  %v2195_v10 = vld [vmem:[#allocation4 + $0xd4] sm:$0xf] }
 0x63b   :  { %v2063_v49 = vld [vmem:[#allocation4 + $0xd8] sm:$0xf0]  ;;  %1584 = vmatpush.bf16.msra.mxu2 %v2070_v53  ;;  %v2062_v57 = vor.u32 %v2196_v12, %v2061_v58  ;;  %v2002_v61 = vor.u32 %v2179_v30, %v1999_v33  ;;  %v1989_v28 = vld [vmem:[#allocation4 + $0x40] sm:$0xf]  ;;  %v2178_v29 = vld [vmem:[#allocation4 + $0x44] sm:$0xf0] }
 0x63c   :  { %1597 = vmatpush.bf16.msra.mxu3 %v2010_v44  ;;  %v2053_v26 = vld [vmem:[#allocation4 + $0xc0] sm:$0xf]  ;;  %v2066_v37 = vor.u32 %v2195_v10, %v2063_v49  ;;  %v2194_v39 = vld [vmem:[#allocation4 + $0xc4] sm:$0xf0]  ;;  %v2177_v43 = vld [vmem:[#allocation4 + $0x44] sm:$0xf]  ;;  %v1990_v31 = vor.u32 %v2178_v29, %v1989_v28  ;;  %v1369_v29 = vpack.c.bf16 %v1363_v21, %v1363_v21 }
 0x63d   :  { %1610 = vmatpush.bf16.msrb.mxu0 %v2074_v27  ;;  %v1991_v47 = vld [vmem:[#allocation4 + $0x48] sm:$0xf0]  ;;  %v2193_v52 = vld [vmem:[#allocation4 + $0xc4] sm:$0xf]  ;;  %v2054_v2 = vor.u32 %v2194_v39, %v2053_v26  ;;  %v1981_v0 = vld [vmem:[#allocation4 + $0x30] sm:$0xf]  ;;  %v1370_v26 = vpack.c.bf16 %v1364_v35, %v1364_v35 }
 0x63e   :  { %v2055_v9 = vld [vmem:[#allocation4 + $0xc8] sm:$0xf0]  ;;  %1572 = vmatpush.bf16.msra.mxu1 %v1998_v55  ;;  %v1994_v20 = vor.u32 %v2177_v43, %v1991_v47  ;;  %v2176_v56 = vld [vmem:[#allocation4 + $0x34] sm:$0xf0]  ;;  %v2045_v3 = vld [vmem:[#allocation4 + $0xb0] sm:$0xf] }
 0x63f   :  { %1585 = vmatpush.bf16.msra.mxu2 %v2062_v57  ;;  %v2058_v5 = vor.u32 %v2193_v52, %v2055_v9  ;;  %v2192_v54 = vld [vmem:[#allocation4 + $0xb4] sm:$0xf0]  ;;  %v2175_v62 = vld [vmem:[#allocation4 + $0x34] sm:$0xf]  ;;  %v1983_v60 = vld [vmem:[#allocation4 + $0x38] sm:$0xf0]  ;;  %v1982_v16 = vor.u32 %v2176_v56, %v1981_v0 }
 0x640   :  { %1598 = vmatpush.bf16.msra.mxu3 %v2002_v61  ;;  %v2191_v7 = vld [vmem:[#allocation4 + $0xb4] sm:$0xf]  ;;  %v2047_v13 = vld [vmem:[#allocation4 + $0xb8] sm:$0xf0]  ;;  %v2046_v8 = vor.u32 %v2192_v54, %v2045_v3  ;;  %v1986_v17 = vor.u32 %v2175_v62, %v1983_v60  ;;  %v1973_v59 = vld [vmem:[#allocation4 + $0x20] sm:$0xf] }
 0x641   :  { %1611 = vmatpush.bf16.msrb.mxu0 %v2066_v37  ;;  %v2174_v22 = vld [vmem:[#allocation4 + $0x24] sm:$0xf0]  ;;  %v2037_v23 = vld [vmem:[#allocation4 + $0xa0] sm:$0xf]  ;;  %v2050_v15 = vor.u32 %v2191_v7, %v2047_v13  ;;  %v2173_v25 = vld [vmem:[#allocation4 + $0x24] sm:$0xf] }
 0x642   :  { %1573 = vmatpush.bf16.msra.mxu1 %v1990_v31  ;;  %v2190_v50 = vld [vmem:[#allocation4 + $0xa4] sm:$0xf0]  ;;  %v1975_v4 = vld [vmem:[#allocation4 + $0x28] sm:$0xf0]  ;;  %v2189_v36 = vld [vmem:[#allocation4 + $0xa4] sm:$0xf]  ;;  %v1974_v41 = vor.u32 %v2174_v22, %v1973_v59 }
 0x643   :  { %1586 = vmatpush.bf16.msra.mxu2 %v2054_v2  ;;  %v2039_v18 = vld [vmem:[#allocation4 + $0xa8] sm:$0xf0]  ;;  %v2038_v46 = vor.u32 %v2190_v50, %v2037_v23  ;;  %v1978_v63 = vor.u32 %v2173_v25, %v1975_v4  ;;  %v1965_v6 = vld [vmem:[#allocation4 + $0x10] sm:$0xf]  ;;  %v2172_v14 = vld [vmem:[#allocation4 + $0x14] sm:$0xf0] }
 0x644   :  { %1599 = vmatpush.bf16.msra.mxu3 %v1994_v20  ;;  %v2029_v19 = vld [vmem:[#allocation4 + $0x90] sm:$0xf]  ;;  %v2042_v24 = vor.u32 %v2189_v36, %v2039_v18  ;;  %v2188_v32 = vld [vmem:[#allocation4 + $0x94] sm:$0xf0]  ;;  %v2171_v34 = vld [vmem:[#allocation4 + $0x14] sm:$0xf]  ;;  %v1966_v42 = vor.u32 %v2172_v14, %v1965_v6 }
 0x645   :  { %1612 = vmatpush.bf16.msrb.mxu0 %v2058_v5  ;;  %v1967_v53 = vld [vmem:[#allocation4 + $0x18] sm:$0xf0]  ;;  %v2187_v38 = vld [vmem:[#allocation4 + $0x94] sm:$0xf]  ;;  %v2030_v44 = vor.u32 %v2188_v32, %v2029_v19  ;;  %v1957_v48 = vld [vmem:[#allocation4] sm:$0xf] }
 0x646   :  { %1574 = vmatpush.bf16.msra.mxu1 %v1982_v16  ;;  %v2031_v40 = vld [vmem:[#allocation4 + $0x98] sm:$0xf0]  ;;  %v1970_v45 = vor.u32 %v2171_v34, %v1967_v53  ;;  %v2170_v51 = vld [vmem:[#allocation4 + $0x4] sm:$0xf0]  ;;  %v2021_v27 = vld [vmem:[#allocation4 + $0x80] sm:$0xf] }
 0x647   :  { %1587 = vmatpush.bf16.msra.mxu2 %v2046_v8  ;;  %v2034_v58 = vor.u32 %v2187_v38, %v2031_v40  ;;  %v2186_v12 = vld [vmem:[#allocation4 + $0x84] sm:$0xf0]  ;;  %v2169_v30 = vld [vmem:[#allocation4 + $0x4] sm:$0xf]  ;;  %v1959_v55 = vld [vmem:[#allocation4 + $0x8] sm:$0xf0]  ;;  %v1958_v49 = vor.u32 %v2170_v51, %v1957_v48 }
 0x648   :  { %1600 = vmatpush.bf16.msra.mxu3 %v1986_v17  ;;  %v2185_v33 = vld [vmem:[#allocation4 + $0x84] sm:$0xf]  ;;  %v2023_v10 = vld [vmem:[#allocation4 + $0x88] sm:$0xf0]  ;;  %v2022_v57 = vor.u32 %v2186_v12, %v2021_v27  ;;  %v1962_v61 = vor.u32 %v2169_v30, %v1959_v55 }
 0x649   :  { %1613 = vmatpush.bf16.msrb.mxu0 %v2050_v15  ;;  %v2026_v28 = vor.u32 %v2185_v33, %v2023_v10  ;;  %v1404_v37 = vld [vmem:[#allocation13 + $0x1] ss:$4 sm:$0x3] }
 0x64a   :  { %1575 = vmatpush.bf16.msra.mxu1 %v1974_v41  ;;  %v1406_v39 = vperm.slane %v1404_v37, 0  ;;  %v1407_v1 = vperm.slane %v1404_v37, 1 }
 0x64b   :  { %1588 = vmatpush.bf16.msra.mxu2 %v2038_v46 }
 0x64c   :  { %1601 = vmatpush.bf16.msra.mxu3 %v1978_v63 }
 0x64d   :  { %1614 = vmatpush.bf16.msrb.mxu0 %v2042_v24 }
 0x64e   :  { %1576 = vmatpush.bf16.msra.mxu1 %v1966_v42 }
 0x64f   :  { %1589 = vmatpush.bf16.msra.mxu2 %v2030_v44 }
 0x650   :  { %1602 = vmatpush.bf16.msra.mxu3 %v1970_v45 }
 0x651   :  { %1615 = vmatpush.bf16.msrb.mxu0 %v2034_v58 }
 0x652   :  { %1577 = vmatpush.bf16.msra.mxu1 %v1958_v49 }
 0x653   :  { %1590 = vmatpush.bf16.msra.mxu2 %v2022_v57 }
 0x654   :  { %1603 = vmatpush.bf16.msra.mxu3 %v1962_v61 }
 0x655   :  { %1616 = vmatpush.bf16.msrb.mxu0 %v2026_v28  ;;  %1578 = vmatmul.bf16.vlgmr.msra.gmra.mxu1 %v1369_v29 }
 0x656   :  { %1591 = vmatmul.bf16.vlgmr.msra.gmra.mxu2 %v1370_v26 }
 0x657   :  { %1604 = vmatmul.bf16.vlgmr.msra.gmra.mxu3 %v1369_v29 }
 0x658   :  { %1617 = vmatmul.bf16.vlgmr.msrb.gmra.mxu0 %v1370_v26 }
 0x6d2   :  { %v1579_v43 = vpop.f32.mrf.mxu1 }
 0x6d3   :  { %v1580_v52 = vadd.f32 %v1579_v43, %v1406_v39 }
 0x6d5   :  { %v1618_v47 = vpop.f32.mrf.mxu0 }
 0x6d9   :  { %v1592_v9 = vpop.f32.mrf.mxu2 }
 0x6da   :  { %v1605_v21 = vpop.f32.mrf.mxu3  ;;  %v1593_v31 = vadd.f32 %v1592_v9, %v1580_v52  ;;  %v1581_v11 = vpop.f32.mrf.mxu1 }
 0x6db   :  { %v1606_v2 = vadd.f32 %v1605_v21, %v1407_v1 }
 0x6dc   :  { %v1622_v20 = vmax.f32 %v1593_v31, 0.0 }
 0x6dd   :  { %v1619_v35 = vadd.f32 %v1618_v47, %v1606_v2  ;;  %v1620_v0 = vpop.f32.mrf.mxu0 }
 0x6df   :  { %v1623_v56 = vmax.f32 %v1619_v35, 0.0 }
 0x6e1   :  { %v1594_v3 = vpop.f32.mrf.mxu2 }
 0x6e2   :  { %v1607_v5 = vpop.f32.mrf.mxu3 }
 0x6e3   :  { %2557 = dma.done.wait [#allocation6 + $0x3], 2048 }
 0x6e4   :  { %2558 = vsyncadd [#allocation6 + $0x3], 4294965248  ;;  %v2208_v54 = vld [vmem:[#allocation5 + $0x38] sm:$0xff]  ;;  %v2207_v60 = vld [vmem:[#allocation5 + $0x30] sm:$0xff]  ;;  %v1627_v18 = vpack.c.bf16 %v1622_v20, %v1622_v20  ;;  %v1628_v41 = vpack.c.bf16 %v1623_v56, %v1623_v56  ;;  %s2570_s8 = smov [#allocation15]   ;;  %s1795_s13 = sshll.u32 %s3324_s10, 4  ;;  %s1796_s13 = int_to_ptr.hbm [resolvable:$true] %s1795_s13 }
 0x6e5   :  { %v2216_v62 = vld [vmem:[#allocation5 + $0x78] sm:$0xff]  ;;  %1759 = vmatpush.bf16.msrb.mxu1 %v2208_v54  ;;  %v2215_v7 = vld [vmem:[#allocation5 + $0x70] sm:$0xff]  ;;  %v2206_v13 = vld [vmem:[#allocation5 + $0x28] sm:$0xff]  ;;  %s1793_s9 = sshll.u32 %s2570_s8, 4  ;;  %s1794_s9 = int_to_ptr.vmem [resolvable:$true] %s1793_s9 }
 0x6e6   :  { %1772 = vmatpush.bf16.msrb.mxu2 %v2216_v62  ;;  %v2214_v16 = vld [vmem:[#allocation5 + $0x68] sm:$0xff]  ;;  %v2205_v8 = vld [vmem:[#allocation5 + $0x20] sm:$0xff]  ;;  %v2204_v59 = vld [vmem:[#allocation5 + $0x18] sm:$0xff] }
 0x6e7   :  { %v2213_v17 = vld [vmem:[#allocation5 + $0x60] sm:$0xff]  ;;  %v2212_v22 = vld [vmem:[#allocation5 + $0x58] sm:$0xff]  ;;  %v2203_v23 = vld [vmem:[#allocation5 + $0x10] sm:$0xff] }
 0x6e8   :  { %v2211_v15 = vld [vmem:[#allocation5 + $0x50] sm:$0xff]  ;;  %v2202_v50 = vld [vmem:[#allocation5 + $0x8] sm:$0xff]  ;;  %v2201_v4 = vld [vmem:[#allocation5] sm:$0xff] }
 0x6e9   :  { %1760 = vmatpush.bf16.msrb.mxu1 %v2207_v60  ;;  %v2210_v25 = vld [vmem:[#allocation5 + $0x48] sm:$0xff]  ;;  %v2209_v36 = vld [vmem:[#allocation5 + $0x40] sm:$0xff]  ;;  %v2350_v46 = vld [vmem:[#allocation13 + $0x2] ss:$0 sm:$0xff] }
 0x6ea   :  { %1773 = vmatpush.bf16.msrb.mxu2 %v2215_v7 }
 0x6ed   :  { %1761 = vmatpush.bf16.msrb.mxu1 %v2206_v13 }
 0x6ee   :  { %1774 = vmatpush.bf16.msrb.mxu2 %v2214_v16 }
 0x6f1   :  { %1762 = vmatpush.bf16.msrb.mxu1 %v2205_v8 }
 0x6f2   :  { %1775 = vmatpush.bf16.msrb.mxu2 %v2213_v17 }
 0x6f5   :  { %1763 = vmatpush.bf16.msrb.mxu1 %v2204_v59 }
 0x6f6   :  { %1776 = vmatpush.bf16.msrb.mxu2 %v2212_v22 }
 0x6f9   :  { %1764 = vmatpush.bf16.msrb.mxu1 %v2203_v23 }
 0x6fa   :  { %1777 = vmatpush.bf16.msrb.mxu2 %v2211_v15 }
 0x6fd   :  { %1765 = vmatpush.bf16.msrb.mxu1 %v2202_v50 }
 0x6fe   :  { %1778 = vmatpush.bf16.msrb.mxu2 %v2210_v25 }
 0x701   :  { %1766 = vmatpush.bf16.msrb.mxu1 %v2201_v4 }
 0x702   :  { %1779 = vmatpush.bf16.msrb.mxu2 %v2209_v36 }
 0x704   :  { %1767 = vmatmul.bf16.vlgmr.msrb.gmra.mxu1 %v1627_v18 }
 0x705   :  { %1780 = vmatmul.bf16.vlgmr.msrb.gmra.mxu2 %v1628_v41 }
 0x781   :  { %v1768_v63 = vpop.f32.mrf.mxu1 }
 0x782   :  { %v1769_v6 = vadd.f32 %v2350_v46, %v1768_v63 }
 0x788   :  { %v1781_v14 = vpop.f32.mrf.mxu2 }
 0x789   :  { %v1782_v19 = vadd.f32 %v1781_v14, %v1769_v6  ;;  %v1770_v24 = vpop.f32.mrf.mxu1 }
 0x78b   :  { %2351 = vtanh.f32 %v1782_v19 }
 0x790   :  { %v1783_v32 = vpop.f32.mrf.mxu2 }
 0x791   :  { %v2352_v34 = vpop.eup %2351 }
 0x792   :  { %v1786_v53 = vmul.f32 2.0, %v2352_v34 }
 0x794   :  { %1787 = vst [vmem:[#allocation15] sm:$0xff] %v1786_v53 }
 0x795   :  { %1798 = dma.vmem_to_hbm [thread:$0]  %s1794_s9, 128, %s1796_s13, [#allocation9]  }
 0x796   :  { %2559 = dma.done.wait [#allocation9], 128  }
 0x797   :  { %2560 = vsyncadd [#allocation9], 4294967168 }
 0x798   :  { %1803 = vsyncpa [#allocation8], 1 }
 0x799   :  { %1804 = vsyncpa [#allocation11], 1 }
 0x79a   :  { %1805 = vsyncpa [#allocation14], 1 }
 0x79b   :  { %1806 = vsyncpa [#allocation9], 1 }
 0x79c   :  { %1807 = vsyncmov [#allocation6] }
 0x79f   :  { %s1808_s5 = vpop.sfrf %1807 }
 0x7a0   :  { %p2147_p0 = scmp.ne.s32.totalorder %s1808_s5, 0 }
 0x7a2   :  { %1812 = shalt.err (%p2147_p0)  }
 0x7a3   :  { %1814 = vsyncmov [#allocation6 + $0x1] }
 0x7a6   :  { %s1815_s14 = vpop.sfrf %1814 }
 0x7a7   :  { %p2148_p1 = scmp.ne.s32.totalorder %s1815_s14, 0 }
 0x7a9   :  { %1819 = shalt.err (%p2148_p1)  }
 0x7aa   :  { %1821 = vsyncmov [#allocation6 + $0x2] }
 0x7ad   :  { %s1822_s10 = vpop.sfrf %1821 }
 0x7ae   :  { %p2149_p2 = scmp.ne.s32.totalorder %s1822_s10, 0 }
 0x7b0   :  { %1826 = shalt.err (%p2149_p2)  }
 0x7b1   :  { %1828 = vsyncmov [#allocation6 + $0x3] }
 0x7b4   :  { %s1829_s15 = vpop.sfrf %1828 }
 0x7b5   :  { %p2150_p3 = scmp.ne.s32.totalorder %s1829_s15, 0 }
 0x7b7   :  { %1833 = shalt.err (%p2150_p3)  }

</bundles_post_ra>
